<compile_context>
chip_gen: v7x
topology: tpu7x:2x2x1
jax: 0.10.0
libtpu: 0.0.40
codegen_flags: <defaults>
</compile_context>

<pallas_src>
import functools
import math

import jax
import jax.numpy as jnp
from jax.experimental import pallas as pl
from jax.experimental.pallas import tpu as pltpu

EXPANSION = 4
BF16 = jnp.bfloat16

K_STEM = 7 * 7 * 3                 # 147
K_STEM_PAD = 256                   # lane-dense A / W blocks for the stem matmul


def _round_up(x, m):
    return ((x + m - 1) // m) * m


def _pad_c(c):
    return max(128, _round_up(c, 128))


def _pick_tm(M, tm_max=1024):
    """Balanced row tile: big (<=tm_max) but with minimal row padding."""
    if M <= tm_max:
        return _round_up(M, 8)
    nt = -(-M // tm_max)
    return _round_up(-(-M // nt), 8)


# ----------------------------------------------------------------------------
# Kernels
# ----------------------------------------------------------------------------
def _mm_bn_kernel(a_ref, w_ref, scale_ref, shift_ref, o_ref, *, relu):
    acc = jnp.dot(a_ref[...], w_ref[...], preferred_element_type=jnp.float32)
    y = acc * scale_ref[...] + shift_ref[...]
    if relu:
        y = jnp.maximum(y, 0.0)
    o_ref[...] = y.astype(o_ref.dtype)


def _mm_bn_res_kernel(a_ref, w_ref, scale_ref, shift_ref, res_ref, o_ref, *, relu):
    acc = jnp.dot(a_ref[...], w_ref[...], preferred_element_type=jnp.float32)
    y = acc * scale_ref[...] + shift_ref[...] + res_ref[...].astype(jnp.float32)
    if relu:
        y = jnp.maximum(y, 0.0)
    o_ref[...] = y.astype(o_ref.dtype)


def _conv3x3_flat_kernel(x_ref, w_ref, scale_ref, shift_ref, o_ref, *, n_rows, Wp):
    # Stride-1 3x3 conv without im2col.  x_ref holds the whole spatially
    # padded image flattened to (Hp*Wp + 2, C) rows (resident in VMEM); tap
    # (dh, dw) is a contiguous row-shift of dh*Wp + dw.  The 9 tap matmuls
    # accumulate in f32; BN + ReLU are fused in the epilogue.  Rows that land
    # in the padded border columns are junk and are sliced off by the caller.
    acc = None
    for k in range(9):
        dh, dw = k // 3, k % 3
        off = dh * Wp + dw
        a = x_ref[0, off:off + n_rows, :]
        d = jnp.dot(a, w_ref[k], preferred_element_type=jnp.float32)
        acc = d if acc is None else acc + d
    y = acc * scale_ref[...] + shift_ref[...]
    y = jnp.maximum(y, 0.0)
    o_ref[0] = y.astype(o_ref.dtype)


def _maxpool_kernel(ee_ref, eo_ref, oe_ref, oo_ref, o_ref, *, Ho, Wo):
    # 3x3 / stride-2 / pad-1 max pool expressed over the 4 even/odd phases of
    # the padded input (contiguous in-kernel slices only, no 9x HBM blob).
    m = ee_ref[0, :Ho, :Wo, :]
    m = jnp.maximum(m, ee_ref[0, :Ho, 1:Wo + 1, :])
    m = jnp.maximum(m, ee_ref[0, 1:Ho + 1, :Wo, :])
    m = jnp.maximum(m, ee_ref[0, 1:Ho + 1, 1:Wo + 1, :])
    m = jnp.maximum(m, eo_ref[0, :Ho, :Wo, :])
    m = jnp.maximum(m, eo_ref[0, 1:Ho + 1, :Wo, :])
    m = jnp.maximum(m, oe_ref[0, :Ho, :Wo, :])
    m = jnp.maximum(m, oe_ref[0, :Ho, 1:Wo + 1, :])
    m = jnp.maximum(m, oo_ref[0, :Ho, :Wo, :])
    o_ref[0] = m


def _head_kernel(x_ref, w_ref, b_ref, o_ref):
    # AvgPool2d(7) over the 49 positions + Linear classifier (padded to 384
    # classes, batch padded to 8 sublanes; caller slices the real logits).
    pooled = jnp.mean(x_ref[...].astype(jnp.float32), axis=1)      # (Bp, C)
    o_ref[...] = (
        jnp.dot(pooled, w_ref[...], preferred_element_type=jnp.float32) + b_ref[...]
    )


# ----------------------------------------------------------------------------
# Memoized pallas_call builders (one compile per distinct shape)
# ----------------------------------------------------------------------------
@functools.lru_cache(maxsize=None)
def _build_matmul(Mp, K, N, tm, relu, has_res):
    a_spec = pl.BlockSpec((tm, K), lambda i: (i, 0))
    w_spec = pl.BlockSpec((K, N), lambda i: (0, 0))
    v_spec = pl.BlockSpec((1, N), lambda i: (0, 0))
    o_spec = pl.BlockSpec((tm, N), lambda i: (i, 0))
    if has_res:
        kernel = functools.partial(_mm_bn_res_kernel, relu=relu)
        in_specs = [a_spec, w_spec, v_spec, v_spec, o_spec]
    else:
        kernel = functools.partial(_mm_bn_kernel, relu=relu)
        in_specs = [a_spec, w_spec, v_spec, v_spec]
    return pl.pallas_call(
        kernel,
        out_shape=jax.ShapeDtypeStruct((Mp, N), BF16),
        grid=(Mp // tm,),
        in_specs=in_specs,
        out_specs=o_spec,
        compiler_params=pltpu.CompilerParams(dimension_semantics=("parallel",)),
    )


@functools.lru_cache(maxsize=None)
def _build_conv3x3(B, Lp, n_rows, Wp, C, Cout):
    kernel = functools.partial(_conv3x3_flat_kernel, n_rows=n_rows, Wp=Wp)
    return pl.pallas_call(
        kernel,
        out_shape=jax.ShapeDtypeStruct((B, n_rows, Cout), BF16),
        grid=(B,),
        in_specs=[
            pl.BlockSpec((1, Lp, C), lambda b: (b, 0, 0)),       # resident per image
            pl.BlockSpec((9, C, Cout), lambda b: (0, 0, 0)),     # all 9 tap weights
            pl.BlockSpec((1, Cout), lambda b: (0, 0)),
            pl.BlockSpec((1, Cout), lambda b: (0, 0)),
        ],
        out_specs=pl.BlockSpec((1, n_rows, Cout), lambda b: (b, 0, 0)),
        compiler_params=pltpu.CompilerParams(dimension_semantics=("parallel",)),
    )


@functools.lru_cache(maxsize=None)
def _build_maxpool(B, Ho, Wo, C):
    kernel = functools.partial(_maxpool_kernel, Ho=Ho, Wo=Wo)
    phase_spec = pl.BlockSpec((1, Ho + 1, Wo + 1, C), lambda b: (b, 0, 0, 0))
    return pl.pallas_call(
        kernel,
        out_shape=jax.ShapeDtypeStruct((B, Ho, Wo, C), BF16),
        grid=(B,),
        in_specs=[phase_spec, phase_spec, phase_spec, phase_spec],
        out_specs=pl.BlockSpec((1, Ho, Wo, C), lambda b: (b, 0, 0, 0)),
        compiler_params=pltpu.CompilerParams(dimension_semantics=("parallel",)),
    )


@functools.lru_cache(maxsize=None)
def _build_head(Bp, HW, C, Np):
    return pl.pallas_call(
        _head_kernel,
        out_shape=jax.ShapeDtypeStruct((Bp, Np), jnp.float32),
        grid=(1,),
        in_specs=[
            pl.BlockSpec((Bp, HW, C), lambda i: (0, 0, 0)),
            pl.BlockSpec((C, Np), lambda i: (0, 0)),
            pl.BlockSpec((1, Np), lambda i: (0, 0)),
        ],
        out_specs=pl.BlockSpec((Bp, Np), lambda i: (0, 0)),
    )


# ----------------------------------------------------------------------------
# Layer wrappers
# ----------------------------------------------------------------------------
def matmul_bn(a, w, scale, shift, *, residual=None, relu=True, tm_max=1024):
    """y = [relu]( a @ w * scale + shift (+ residual) ), row-tiled, bf16 out."""
    M, K = a.shape
    N = w.shape[1]
    tm = _pick_tm(M, tm_max)
    Mp = _round_up(M, tm)
    if Mp != M:
        # Padded rows compute garbage (== shift [+ residual]); they are sliced
        # off below and must never be reduced over.
        a = jnp.pad(a, ((0, Mp - M), (0, 0)))
        if residual is not None:
            residual = jnp.pad(residual, ((0, Mp - M), (0, 0)))
    call = _build_matmul(Mp, K, N, tm, relu, residual is not None)
    args = (a, w, scale, shift) if residual is None else (a, w, scale, shift, residual)
    out = call(*args)
    return out[:M] if Mp != M else out


def conv1x1_bn(x, w, scale, shift, *, stride=1, relu=True, residual=None):
    """1x1 conv (no bias) + folded BN + optional residual + optional ReLU (NHWC)."""
    if stride != 1:
        x = x[:, ::stride, ::stride, :]
    B, H, W, C = x.shape
    Cout = w.shape[1]
    a = x.reshape(B * H * W, C)
    res = residual.reshape(B * H * W, Cout) if residual is not None else None
    y = matmul_bn(a, w, scale, shift, residual=res, relu=relu)
    return y.reshape(B, H, W, Cout)


def conv3x3_bn(x, w_taps, scale, shift, *, stride=1):
    """3x3 conv + folded BN + ReLU.  Stride-1 uses the tap-accumulation Pallas
    kernel (no im2col); the three stride-2 convs use a tiny im2col fallback."""
    B, H, W, C = x.shape
    Cout = w_taps.shape[-1]
    xp = jnp.pad(x, ((0, 0), (1, 1), (1, 1), (0, 0)))
    if stride == 1:
        Hp, Wp = H + 2, W + 2
        n_rows = H * Wp                       # "wide" rows incl. 2 junk cols/row
        Lp = Hp * Wp + 2                      # +2 guard rows for the largest tap
        xf = jnp.pad(xp.reshape(B, Hp * Wp, C), ((0, 0), (0, 2), (0, 0)))
        yw = _build_conv3x3(B, Lp, n_rows, Wp, C, Cout)(xf, w_taps, scale, shift)
        return yw.reshape(B, H, Wp, Cout)[:, :, :W, :]
    Ho = (H - 1) // stride + 1
    Wo = (W - 1) // stride + 1
    patches = [
        xp[:, dh:dh + stride * Ho:stride, dw:dw + stride * Wo:stride, :]
        for dh in range(3) for dw in range(3)
    ]
    a = jnp.concatenate(patches, axis=-1).reshape(B * Ho * Wo, 9 * C)
    y = matmul_bn(a, w_taps.reshape(9 * C, Cout), scale, shift, relu=True)
    return y.reshape(B, Ho, Wo, Cout)


def maxpool_3x3_s2_p1(x):
    """MaxPool2d(kernel=3, stride=2, padding=1) on NHWC (post-ReLU input)."""
    B, H, W, C = x.shape
    Ho, Wo = (H - 1) // 2 + 1, (W - 1) // 2 + 1
    # Post-ReLU activations are >= 0, so zero padding is equivalent to -inf.
    xp = jnp.pad(x, ((0, 0), (1, 1), (1, 1), (0, 0)))
    ee = xp[:, 0::2, 0::2, :]
    eo = xp[:, 0::2, 1::2, :]
    oe = xp[:, 1::2, 0::2, :]
    oo = xp[:, 1::2, 1::2, :]
    return _build_maxpool(B, Ho, Wo, C)(ee, eo, oe, oo)


def avgpool_linear(x, w, b, num_classes):
    """Fused AvgPool2d(avgpool_size) + Linear classifier."""
    B, H, W, C = x.shape
    feats = x.reshape(B, H * W, C)
    Bp = max(8, _round_up(B, 8))
    if Bp != B:
        feats = jnp.pad(feats, ((0, Bp - B), (0, 0), (0, 0)))
    Np = w.shape[1]
    out = _build_head(Bp, H * W, C, Np)(feats, w, b)
    return out[:B, :num_classes]


# ----------------------------------------------------------------------------
# Parameter construction (deterministic, synthetic, pre-padded + bf16)
# ----------------------------------------------------------------------------
def _init_conv(key, k, cin, cout):
    fan_in = k * k * cin
    return jax.random.normal(key, (k, k, cin, cout), jnp.float32) / math.sqrt(fan_in)


def _init_bn(key, c, cpad):
    k1, k2, k3 = jax.random.split(key, 3)
    gamma = 1.0 + 0.1 * jax.random.normal(k1, (c,), jnp.float32)
    beta = 0.1 * jax.random.normal(k2, (c,), jnp.float32)
    mean = 0.1 * jax.random.normal(k3, (c,), jnp.float32)
    var = jnp.ones((c,), jnp.float32)
    scale = gamma / jnp.sqrt(var + 1e-5)
    shift = beta - mean * scale
    scale = jnp.pad(scale, (0, cpad - c)).reshape(1, cpad)   # padded chans -> 0
    shift = jnp.pad(shift, (0, cpad - c)).reshape(1, cpad)
    return scale, shift


def _pad_w2d(w2d, kin_pad, cout_pad):
    kin, cout = w2d.shape
    return jnp.pad(w2d, ((0, kin_pad - kin), (0, cout_pad - cout))).astype(BF16)


def build_params(key, *, width=8, num_classes=257):
    keys = iter(jax.random.split(key, 1024))
    nk = lambda: next(keys)

    P = {}
    cpad = _pad_c(width)
    w7 = _init_conv(nk(), 7, 3, width)
    P["stem_w"] = _pad_w2d(w7.reshape(K_STEM, width), K_STEM_PAD, cpad)
    P["stem_s"], P["stem_sh"] = _init_bn(nk(), width, cpad)

    # ResNet-50 stage config (scaled width): planes, num_blocks, first stride.
    layer_cfg = [(width, 3, 1), (width * 2, 4, 2), (width * 4, 6, 2), (width * 8, 3, 2)]
    inplanes = width
    layers = []
    for planes, nblocks, stride in layer_cfg:
        blocks = []
        for bidx in range(nblocks):
            s = stride if bidx == 0 else 1
            cin_p = _pad_c(inplanes)
            mid_p = _pad_c(planes)
            out_p = _pad_c(planes * EXPANSION)
            blk = {"stride": s}
            blk["w1"] = _pad_w2d(
                _init_conv(nk(), 1, inplanes, planes).reshape(inplanes, planes),
                cin_p, mid_p)
            blk["s1"], blk["sh1"] = _init_bn(nk(), planes, mid_p)
            w2 = _init_conv(nk(), 3, planes, planes)
            w2 = jnp.pad(w2, ((0, 0), (0, 0), (0, mid_p - planes), (0, mid_p - planes)))
            blk["w2"] = w2.reshape(9, mid_p, mid_p).astype(BF16)
            blk["s2"], blk["sh2"] = _init_bn(nk(), planes, mid_p)
            blk["w3"] = _pad_w2d(
                _init_conv(nk(), 1, planes, planes * EXPANSION)
                .reshape(planes, planes * EXPANSION),
                mid_p, out_p)
            blk["s3"], blk["sh3"] = _init_bn(nk(), planes * EXPANSION, out_p)
            if s != 1 or inplanes != planes * EXPANSION:
                blk["wd"] = _pad_w2d(
                    _init_conv(nk(), 1, inplanes, planes * EXPANSION)
                    .reshape(inplanes, planes * EXPANSION),
                    cin_p, out_p)
                blk["sd"], blk["shd"] = _init_bn(nk(), planes * EXPANSION, out_p)
            blocks.append(blk)
            inplanes = planes * EXPANSION
        layers.append(blocks)
    P["layers"] = layers

    feat = inplanes                    # scaled stand-in for 2048
    feat_p = _pad_c(feat)
    ncls_p = _round_up(num_classes, 128)      # 257 -> 384
    fc_w = jax.random.normal(nk(), (feat, num_classes), jnp.float32) / math.sqrt(feat)
    P["fc_w"] = jnp.pad(fc_w, ((0, feat_p - feat), (0, ncls_p - num_classes)))
    fc_b = 0.01 * jax.random.normal(nk(), (num_classes,), jnp.float32)
    P["fc_b"] = jnp.pad(fc_b, (0, ncls_p - num_classes)).reshape(1, ncls_p)
    P["num_classes"] = num_classes
    return P


# ----------------------------------------------------------------------------
# Model forward (Branch=1, Conv_Type=0)
# ----------------------------------------------------------------------------
def stem_forward(x, P):
    # conv7x7 / stride 2 / pad 3 + BN + ReLU via im2col (K padded 147 -> 256).
    B, H, W, _ = x.shape
    Ho, Wo = H // 2, W // 2
    xp = jnp.pad(x, ((0, 0), (3, 3), (3, 3), (0, 0)))
    patches = [
        xp[:, dh:dh + 2 * Ho:2, dw:dw + 2 * Wo:2, :]
        for dh in range(7) for dw in range(7)
    ]
    a = jnp.concatenate(patches, axis=-1).reshape(B * Ho * Wo, K_STEM)
    a = jnp.pad(a, ((0, 0), (0, K_STEM_PAD - K_STEM))).astype(BF16)
    y = matmul_bn(a, P["stem_w"], P["stem_s"], P["stem_sh"], relu=True)
    return y.reshape(B, Ho, Wo, P["stem_w"].shape[1])


def bottleneck_forward(x, blk):
    out = conv1x1_bn(x, blk["w1"], blk["s1"], blk["sh1"], relu=True)
    out = conv3x3_bn(out, blk["w2"], blk["s2"], blk["sh2"], stride=blk["stride"])
    if "wd" in blk:
        residual = conv1x1_bn(x, blk["wd"], blk["sd"], blk["shd"],
                              stride=blk["stride"], relu=False)
    else:
        residual = x
    # out = relu(bn3(conv3(out)) + residual)  (residual add fused in epilogue)
    return conv1x1_bn(out, blk["w3"], blk["s3"], blk["sh3"], relu=True,
                      residual=residual)


def sigmoid_resnet_forward(x_nchw, P, *, avgpool_size=7):
    x = jnp.transpose(x_nchw, (0, 2, 3, 1)).astype(jnp.float32)   # NCHW -> NHWC
    x = stem_forward(x, P)
    x = maxpool_3x3_s2_p1(x)
    for blocks in P["layers"]:
        for blk in blocks:
            x = bottleneck_forward(x, blk)
    B, H, W, C = x.shape
    assert H == avgpool_size and W == avgpool_size, (H, W)
    # AvgPool2d(7, stride=1) -> flatten -> Linear (no sigmoid, matching ref).
    return avgpool_linear(x, P["fc_w"], P["fc_b"], P["num_classes"])


if __name__ == "__main__":
    key = jax.random.PRNGKey(0)
    pkey, xkey = jax.random.split(key)

    # Scaled-down ResNet-50 (width 8 instead of 64 -> final feature dim 256
    # instead of 2048) so the synthetic demo stays small; structure is exact.
    params = build_params(pkey, width=8, num_classes=257)

    # input_size=224 keeps the module's avgpool_size=7 semantics exact.
    x = jax.random.normal(xkey, (2, 3, 224, 224), jnp.float32)    # NCHW like PyTorch

    logits = sigmoid_resnet_forward(x, params)
    logits = jax.block_until_ready(logits)

    assert logits.shape == (2, 257), logits.shape
    assert bool(jnp.isfinite(logits).all())
    print("KERNEL_OK")
</pallas_src>

<mosaic_0001>
module attributes {stable_mosaic.version = 11 : i64} {
  func.func @_mm_bn_kernel(%arg0: i32, %arg1: memref<1008x256xbf16, #tpu.memory_space<vmem>>, %arg2: memref<256x128xbf16, #tpu.memory_space<vmem>>, %arg3: memref<1x128xf32, #tpu.memory_space<vmem>>, %arg4: memref<1x128xf32, #tpu.memory_space<vmem>>, %arg5: memref<1008x128xbf16, #tpu.memory_space<vmem>>) attributes {dimension_semantics = [#tpu.dimension_semantics<parallel>], iteration_bounds = array<i64: 25>, scalar_prefetch = 0 : i64, scratch_operands = 0 : i64, tpu.core_type = #tpu.core_type<tc>, window_params = [{transform_indices = @transform_0, window_bounds = array<i64: 1008, 256>}, {pipeline_mode = #tpu.pipeline_mode<synchronous>, transform_indices = @transform_1, window_bounds = array<i64: 256, 128>}, {pipeline_mode = #tpu.pipeline_mode<synchronous>, transform_indices = @transform_2, window_bounds = array<i64: 1, 128>}, {pipeline_mode = #tpu.pipeline_mode<synchronous>, transform_indices = @transform_3, window_bounds = array<i64: 1, 128>}, {transform_indices = @transform_4, window_bounds = array<i64: 1008, 128>}]} {
    %c0 = arith.constant 0 : index
    %c0_0 = arith.constant 0 : index
    %0 = vector.load %arg1[%c0, %c0_0] : memref<1008x256xbf16, #tpu.memory_space<vmem>>, vector<1008x256xbf16>
    %c0_1 = arith.constant 0 : index
    %c0_2 = arith.constant 0 : index
    %1 = vector.load %arg2[%c0_1, %c0_2] : memref<256x128xbf16, #tpu.memory_space<vmem>>, vector<256x128xbf16>
    %cst = arith.constant dense<0.000000e+00> : vector<1008x128xf32>
    %2 = tpu.matmul %0, %1, %cst {dimension_numbers = #tpu.dot_dimension_numbers<[1], [0], [0], [1], [0, 0, 1, 1], [], []>} : vector<1008x256xbf16>, vector<256x128xbf16>, vector<1008x128xf32> -> vector<1008x128xf32>
    %c0_3 = arith.constant 0 : index
    %c0_4 = arith.constant 0 : index
    %3 = vector.load %arg3[%c0_3, %c0_4] : memref<1x128xf32, #tpu.memory_space<vmem>>, vector<1x128xf32>
    %4 = vector.broadcast %3 : vector<1x128xf32> to vector<1008x128xf32>
    %5 = arith.mulf %2, %4 : vector<1008x128xf32>
    %c0_5 = arith.constant 0 : index
    %c0_6 = arith.constant 0 : index
    %6 = vector.load %arg4[%c0_5, %c0_6] : memref<1x128xf32, #tpu.memory_space<vmem>>, vector<1x128xf32>
    %7 = vector.broadcast %6 : vector<1x128xf32> to vector<1008x128xf32>
    %8 = arith.addf %5, %7 : vector<1008x128xf32>
    %cst_7 = arith.constant 0.000000e+00 : f32
    %9 = vector.broadcast %cst_7 : f32 to vector<1008x128xf32>
    %10 = arith.maximumf %8, %9 : vector<1008x128xf32>
    %11 = arith.truncf %10 : vector<1008x128xf32> to vector<1008x128xbf16>
    %c0_8 = arith.constant 0 : index
    %c0_9 = arith.constant 0 : index
    %12 = vector.load %arg5[%c0_8, %c0_9] : memref<1008x128xbf16, #tpu.memory_space<vmem>>, vector<1008x128xbf16>
    tpu.vector_store %arg5[%c0_8, %c0_9], %11 {strides = array<i32>} : memref<1008x128xbf16, #tpu.memory_space<vmem>>, vector<1008x128xbf16>,
    return
  }
  func.func @transform_0(%arg0: i32) -> (i32, i32) {
    %c0_i32 = arith.constant 0 : i32
    %c0_i32_0 = arith.constant 0 : i32
    return %arg0, %c0_i32 : i32, i32
  }
  func.func @transform_1(%arg0: i32) -> (i32, i32) {
    %c0_i32 = arith.constant 0 : i32
    %c0_i32_0 = arith.constant 0 : i32
    %c0_i32_1 = arith.constant 0 : i32
    return %c0_i32, %c0_i32_0 : i32, i32
  }
  func.func @transform_2(%arg0: i32) -> (i32, i32) {
    %c0_i32 = arith.constant 0 : i32
    %c0_i32_0 = arith.constant 0 : i32
    %c0_i32_1 = arith.constant 0 : i32
    return %c0_i32, %c0_i32_0 : i32, i32
  }
  func.func @transform_3(%arg0: i32) -> (i32, i32) {
    %c0_i32 = arith.constant 0 : i32
    %c0_i32_0 = arith.constant 0 : i32
    %c0_i32_1 = arith.constant 0 : i32
    return %c0_i32, %c0_i32_0 : i32, i32
  }
  func.func @transform_4(%arg0: i32) -> (i32, i32) {
    %c0_i32 = arith.constant 0 : i32
    %c0_i32_0 = arith.constant 0 : i32
    return %arg0, %c0_i32 : i32, i32
  }
}

</mosaic_0001>

<bundles_post_ra>
// kernel: tpu_custom_call.1
= control target key start
LH: loop header
LB: loop body
LE: loop exit
PB: predicated region body
PF: predicated region fallthrough
CT: control target
= control target key end

     0   :  { %9 = vsyncpa [#allocation3], 0  ;;  %s4909_s0 = inlined_call_operand.hbm [shape: bf16[25200,256], index: 0, kind: input, shape index: {}]   ;;  %s4910_s1 = inlined_call_operand.hbm [shape: bf16[256,128], index: 1, kind: input, shape index: {}]   ;;  %s4911_s2 = inlined_call_operand.hbm [shape: f32[1,128], index: 2, kind: input, shape index: {}]   ;;  %s4912_s3 = inlined_call_operand.hbm [shape: f32[1,128], index: 3, kind: input, shape index: {}]   ;;  %s4913_s4 = inlined_call_operand.hbm [shape: bf16[25200,128], index: 4, kind: output, shape index: {}]  }
   0x1   :  { %11 = vsyncpa [#allocation3 + $0x1], 0 }
   0x2   :  { %12 = vsyncpa [#allocation6], 0 }
   0x3   :  { %13 = vsyncpa [#allocation9], 0 }
   0x4   :  { %14 = vsyncpa [#allocation4], 0 }
   0x5   :  { %16 = vsyncpa [#allocation4 + $0x1], 0  ;;  %s4164_s15 = smov 0   ;;  %s4166_s16 = smov 0  }
   0x6   :  { %s4168_s17 = smov 0   ;;  %s4170_s18 = smov 0  }
   0x7 LB: > { %s4185_s19 = sadd.s32 4294967295, %s4125_s18   ;;  %s2819_s20 = sadd.s32 4294967294, %s4125_s18   ;;  %s4125_s18 = sphi %s4170_s18, %s4935_s18   ;;  %s4121_s17 = sphi %s4168_s17, %s4934_s17   ;;  %s4117_s16 = sphi %s4166_s16, %s4933_s16   ;;  %s4113_s15 = sphi %s4164_s15, %s4932_s15  }
   0x8   : > { %p42_p0 = scmp.ne.s32.totalorder %s4117_s16, %s4113_s15  ;;  %p4914_p1 = scmp.eq.s32.totalorder %s4185_s19, 0 }
   0x9   : > { %p135_p3 = scmp.eq.s32.totalorder %s2819_s20, 24  ;;  %p2820_p5 = scmp.ge.s32.totalorder %s4125_s18, 1 }
   0xa   : > { %p4194_p4 = por %p4914_p1, %p42_p0  ;;  %p142_p7 = scmp.lt.s32.totalorder %s4125_s18, 26 }
   0xb   : > { %p4199_p6 = por %p135_p3, %p42_p0  ;;  %s4127_s24 = smov [#allocation5]  }
   0xc   : > { %s4917_s21 = scalar_select %p4194_p4, 1, 0 }
   0xd   : > { %s4918_s22 = scalar_select %p4199_p6, 1, 0 }
   0xe   : > { %p4204_p8 = pnand %p2820_p5, %p142_p7  ;;  %s154_s25 = sshll.u32 %s4127_s24, 4  ;;  %s4208_s25 = int_to_ptr.vmem [resolvable:$true] %s154_s25 }
   0xf   : > { %s4128_s27 = smov [#allocation7]   ;;  %s4129_s29 = smov [#allocation8]  }
  0x10   : > { %s4919_s23 = scalar_select %p4204_p8, 1, 0 }
  0x11   : > { %p3662_p9 = pneg %p4204_p8  ;;  %s168_s28 = sshll.u32 %s4128_s27, 4  ;;  %s4218_s28 = int_to_ptr.vmem [resolvable:$true] %s168_s28 }
  0x12   : > { %s4220_s30 = sshll.u32 %s4129_s29, 4  ;;  %s3937_s7 = scalar_lea.hbm %s4910_s1, 2048  ;;  %s180_s30 = int_to_ptr.vmem [resolvable:$true] %s4220_s30 }
  0x13   : > { %p4214_p10 = pnand %p3662_p9, %p4914_p1  ;;  %p3938_p11 = scmp.ne.s32.totalorder %s4910_s1, %s3937_s7 }
  0x14   : > { %p3944_p3 = scmp.lt.u32.totalorder %s3937_s7, %s4910_s1 }
  0x15   : > { %p4230_p12 = pneg %p4214_p10 }
  0x17   : > { %p3940_p13 = pnand %p4230_p12, %p3938_p11 }
  0x19   : > { %p3941_p0 = pneg %p3940_p13 }
  0x1b   : > { %p3946_p5 = pnand %p3944_p3, %p3941_p0 }
  0x1d   : > { %3949 = shalt.err (!%p3946_p5)
}
  0x1e   : > { %s3950_s13 = scalar_lea.vmem %s4208_s25, 2048  ;;  %p3958_p2 = scmp.lt.s32.totalorder %s4208_s25, %s4208_s25 }
  0x1f   : > { %p3951_p7 = scmp.ne.s32.totalorder %s4208_s25, %s3950_s13  ;;  %p3959_p6 = scmp.lt.s32.totalorder %s3950_s13, %s3950_s13 }
  0x21   : > { %p3953_p9 = pnand %p3951_p7, %p4230_p12  ;;  %p3960_p11 = por %p3959_p6, %p3958_p2 }
  0x23   : > { %p3954_p1 = pneg %p3953_p9 }
  0x25   : > { %p3961_p13 = pnand %p3960_p11, %p3954_p1 }
  0x27   : > { %3964 = shalt.err (!%p3961_p13)
}
  0x28   : > { %s4130_s14 = smov 64   ;;  %s4131_s20 = smov 4  }
  0x29   : > { %3665 = dma.hbm_to_vmem [thread:$0]  (!%p4214_p10), %s4910_s1, 2048, %s4208_s25, [#allocation6], %s4130_s14, %s4130_s14, %s4131_s20  }
  0x2a   : > { %s3965_s6 = scalar_lea.hbm %s4911_s2, 16 }
  0x2b   : > { %p3966_p2 = scmp.ne.s32.totalorder %s4911_s2, %s3965_s6  ;;  %p3972_p0 = scmp.lt.u32.totalorder %s3965_s6, %s4911_s2 }
  0x2d   : > { %p3968_p1 = pnand %p3966_p2, %p4230_p12 }
  0x2f   : > { %p3969_p6 = pneg %p3968_p1 }
  0x31   : > { %p3974_p3 = pnand %p3972_p0, %p3969_p6 }
  0x33   : > { %3977 = shalt.err (!%p3974_p3)
}
  0x34   : > { %s3978_s25 = scalar_lea.vmem %s4218_s28, 16  ;;  %s3985_s12 = scalar_lea.vmem %s4218_s28, 32 }
  0x35   : > { %p3979_p5 = scmp.ne.s32.totalorder %s4218_s28, %s3978_s25  ;;  %p3986_p11 = scmp.lt.s32.totalorder %s4218_s28, %s4218_s28 }
  0x36   : > { %p3987_p13 = scmp.lt.s32.totalorder %s3985_s12, %s3978_s25 }
  0x37   : > { %p3981_p7 = pnand %p3979_p5, %p4230_p12 }
  0x38   : > { %p3988_p2 = por %p3987_p13, %p3986_p11 }
  0x39   : > { %p3982_p9 = pneg %p3981_p7 }
  0x3b   : > { %p3989_p1 = pnand %p3988_p2, %p3982_p9 }
  0x3d   : > { %3992 = shalt.err (!%p3989_p1)
}
  0x3e   : > { %3668 = dma.hbm_to_vmem [thread:$0]  (!%p4214_p10), %s4911_s2, 16, %s4218_s28, [#allocation6]  }
  0x3f   : > { %s3993_s27 = scalar_lea.hbm %s4912_s3, 16 }
  0x40   : > { %p3994_p6 = scmp.ne.s32.totalorder %s4912_s3, %s3993_s27  ;;  %p4000_p5 = scmp.lt.u32.totalorder %s3993_s27, %s4912_s3 }
  0x42   : > { %p3996_p0 = pnand %p3994_p6, %p4230_p12 }
  0x44   : > { %p3997_p3 = pneg %p3996_p0 }
  0x46   : > { %p4002_p7 = pnand %p4000_p5, %p3997_p3 }
  0x48   : > { %4005 = shalt.err (!%p4002_p7)
}
  0x49   : > { %s4006_s8 = scalar_lea.vmem %s180_s30, 16  ;;  %s4013_s28 = scalar_lea.vmem %s180_s30, 32 }
  0x4a   : > { %p4007_p9 = scmp.ne.s32.totalorder %s180_s30, %s4006_s8  ;;  %p4014_p2 = scmp.lt.s32.totalorder %s180_s30, %s180_s30 }
  0x4b   : > { %p4015_p1 = scmp.lt.s32.totalorder %s4013_s28, %s4006_s8 }
  0x4c   : > { %p4009_p11 = pnand %p4007_p9, %p4230_p12 }
  0x4d   : > { %p4016_p4 = por %p4015_p1, %p4014_p2 }
  0x4e   : > { %p4010_p13 = pneg %p4009_p11 }
  0x50   : > { %p4017_p8 = pnand %p4016_p4, %p4010_p13 }
  0x52   : > { %4020 = shalt.err (!%p4017_p8)
}
  0x53   : > { %3671 = dma.hbm_to_vmem [thread:$0]  (!%p4214_p10), %s4912_s3, 16, %s180_s30, [#allocation9]  }
  0x54   : > { %s4295_s10 = sadd.s32 1, %s4125_s18   ;;  %s29_s26 = sadd.s32 1, %s4121_s17 }
  0x55   : > { %s26_s25 = ssub.s32 %s4125_s18, %s4295_s10  ;;  %p36_p8 = scmp.ne.s32.totalorder %s4121_s17, %s4117_s16 }
  0x56   : > { %p27_p4 = scmp.eq.s32.totalorder %s26_s25, 0  ;;  %p37_p12 = scmp.eq.s32.totalorder %s4125_s18, 0 }
  0x57   : > { %p3683_p6 = scmp.lt.s32.totalorder %s4125_s18, 25  ;;  %p4922_p3 = scmp.eq.s32.totalorder %s4185_s19, 24 }
  0x58   : > { %s4305_s12 = scalar_select %p27_p4, %s4121_s17, %s29_s26  }
  0x59   : > { %p38_p0 = por %p37_p12, %p36_p8  ;;  %p4309_p5 = por %p4922_p3, %p36_p8 }
  0x5a   : > { %s190_s14 = sand.u32 1, %s4121_s17   ;;  %s3548_s20 = smul.u32 16128, %s4125_s18 }
  0x5b   : > { %s3643_s30 = smul.u32 1008, %s190_s14  ;;  %p4320_p10 = pnand %p3683_p6, %p38_p0 }
  0x5c   : > { %s4318_s29 = scalar_lea.hbm %s4909_s0, %s3548_s20  ;;  %s4326_s8 = scalar_lea.sflag [#allocation3], %s190_s14 }
  0x5d   : > { %s194_s6 = scalar_lea.vmem [#allocation2], %s3643_s30  ;;  %s4021_s28 = scalar_lea.hbm %s4318_s29, 16128 }
  0x5e   : > { %s202_s7 = sshll.u32 %s194_s6, 4  ;;  %p4022_p7 = scmp.ne.s32.totalorder %s4318_s29, %s4021_s28  ;;  %s4324_s7 = int_to_ptr.vmem [resolvable:$true] %s202_s7 }
  0x5f   : > { %p4023_p9 = pneg %p4320_p10  ;;  %s4026_s25 = scalar_lea.hbm %s4909_s0, 403200 }
  0x60   : > { %p4027_p2 = scmp.lt.u32.totalorder %s4318_s29, %s4909_s0  ;;  %p4028_p1 = scmp.lt.u32.totalorder %s4026_s25, %s4021_s28 }
  0x61   : > { %p4024_p11 = pnand %p4023_p9, %p4022_p7  ;;  %p4030_p8 = scmp.lt.u32.totalorder %s4021_s28, %s4318_s29 }
  0x62   : > { %p4029_p4 = por %p4028_p1, %p4027_p2 }
  0x63   : > { %p4025_p13 = pneg %p4024_p11 }
  0x64   : > { %p4031_p12 = por %p4030_p8, %p4029_p4 }
  0x66   : > { %p4032_p6 = pnand %p4031_p12, %p4025_p13 }
  0x68   : > { %4035 = shalt.err (!%p4032_p6)
}
  0x69   : > { %s4036_s14 = scalar_lea.vmem %s4324_s7, 16128  ;;  %s4132_s30 = smov [#allocation2]  }
  0x6a   : > { %p4037_p0 = scmp.ne.s32.totalorder %s4324_s7, %s4036_s14  ;;  %s4041_s24 = sshll.u32 %s4132_s30, 4  ;;  %s4042_s24 = int_to_ptr.vmem [resolvable:$false] %s4041_s24 }
  0x6b   : > { %s4043_s27 = scalar_lea.vmem %s4042_s24, 32256  ;;  %p4044_p11 = scmp.lt.s32.totalorder %s4324_s7, %s4042_s24 }
  0x6c   : > { %p4039_p3 = pnand %p4037_p0, %p4023_p9  ;;  %p4045_p2 = scmp.lt.s32.totalorder %s4043_s27, %s4036_s14 }
  0x6e   : > { %p4040_p7 = pneg %p4039_p3  ;;  %p4046_p1 = por %p4045_p2, %p4044_p11 }
  0x70   : > { %p4047_p4 = pnand %p4046_p1, %p4040_p7 }
  0x72   : > { %4050 = shalt.err (!%p4047_p4)
}
  0x73   : > { %s4133_s6 = smov 128   ;;  %s4134_s28 = smov 8  }
  0x74   : > { %3675 = dma.hbm_to_vmem [thread:$0]  (!%p4320_p10), %s4318_s29, 16128, %s4324_s7, %s4326_s8, %s4133_s6, %s4133_s6, %s4134_s28  }
  0x75   : > { %p4925_p9 = scmp.ne.s32.totalorder %s4919_s23, 0 }
  0x76   : > { %s4357_s9 = sand.u32 (!%p4925_p9), 1, %s4117_s16   ;;  %p4926_p13 = scmp.ne.s32.totalorder (!%p4925_p9), %s4917_s21, 0 }
  0x77   : > { %214 = sbr.rel (%p4925_p9) target bundleno = 684 (0x2ac), region = 36  ;;  %s217_s25 = scalar_lea.sflag (!%p4925_p9), [#allocation3], %s4357_s9 }
  0x78   : > { %s3644_s11 = smul.u32 (!%p4925_p9), 1008, %s4357_s9 }
  0x7a   : > { %s4361_s26 = scalar_lea.vmem (!%p4925_p9), [#allocation2], %s3644_s11 }
  0x7e   : > { %4096 = dma.done.wait (%p4926_p13), %s217_s25, 16128  }
  0x7f   : > { %4098 = vsyncadd (%p4926_p13), %s217_s25, 4294951168  ;;  %p4927_p10 = scmp.eq.s32.totalorder %s4185_s19, 0 }
  0x81   : > { %4100 = dma.done.wait (%p4927_p10), [#allocation6], 2064   ;;  %p4928_p8 = pmov %p4927_p10 }
  0x83   : > { %4102 = vsyncadd (%p4928_p8), [#allocation6], 4294965232  ;;  %p4929_p12 = pmov %p4928_p8 }
  0x84   : > { %p4930_p6 = pmov %p4928_p8 }
  0x85   : > { %4104 = dma.done.wait (%p4929_p12), [#allocation9], 16  }
  0x86   : > { %4106 = vsyncadd (%p4930_p6), [#allocation9], 4294967280  ;;  %v4135_v0 = vmov 0   ;;  %v3730_v1 = vld [vmem:[#allocation5] sm:$0xff]   ;;  %v3731_v2 = vld [vmem:[#allocation5 + $0x8] sm:$0xff]   ;;  %s3645_s21 = smul.u32 504, %s4357_s9 }
  0x87   : > { %1144 = vmatprep.subr.bf16.mxu0 %v4135_v0  ;;  %3611 = vmatprep.subr.bf16.mxu1 %v4135_v0  ;;  %v3732_v3 = vld [vmem:[#allocation5 + $0x10] sm:$0xff]   ;;  %v3733_v4 = vld [vmem:[#allocation5 + $0x18] sm:$0xff]   ;;  %v3734_v5 = vld [vmem:[#allocation5 + $0x20] sm:$0xff]   ;;  %s3232_s29 = smul.u32 8064, %s4185_s19  ;;  %s2704_s14 = scalar_lea.sflag [#allocation4], %s4357_s9 }
  0x88   : > { %1145 = vmatpush1.bf16.msra.mxu0 %v3730_v1  ;;  %3627 = vmatpush1.bf16.msra.mxu1 %v3730_v1  ;;  %v3748_v6 = vld [vmem:[%s4361_s26 + $0x4] ss:$8 sps:$4 sm:$0xff]   ;;  %v3746_v19 = vld [vmem:[%s4361_s26] ss:$8 sps:$4 sm:$0xff]   ;;  %v3752_v21 = vld [vmem:[%s4361_s26 + $0x14] ss:$8 sps:$4 sm:$0xff]  }
  0x89   : > { %1146 = vmatprep.subr.bf16.mxu0 %v4135_v0  ;;  %3612 = vmatprep.subr.bf16.mxu1 %v4135_v0  ;;  %v3735_v7 = vld [vmem:[#allocation5 + $0x28] sm:$0xff]   ;;  %v3736_v9 = vld [vmem:[#allocation5 + $0x30] sm:$0xff]   ;;  %v3737_v10 = vld [vmem:[#allocation5 + $0x38] sm:$0xff]   ;;  %s4540_s23 = scalar_lea.vmem [#allocation10], %s3645_s21  ;;  %s4863_s20 = scalar_lea.hbm %s4913_s4, %s3232_s29 }
  0x8a   : > { %v3751_v8 = vld [vmem:[%s4361_s26 + $0x204] ss:$8 sps:$4 sm:$0xff]   ;;  %1176 = vmatprep.mubr.bf16.mxu0 %v3748_v6  ;;  %v3749_v20 = vld [vmem:[%s4361_s26 + $0x200] ss:$8 sps:$4 sm:$0xff]   ;;  %v3755_v22 = vld [vmem:[%s4361_s26 + $0x214] ss:$8 sps:$4 sm:$0xff]  }
  0x8b   : > { %1432 = vmatprep.mubr.bf16.mxu1 %v3751_v8  ;;  %v3738_v11 = vld [vmem:[#allocation5 + $0x40] sm:$0xff]   ;;  %v3739_v12 = vld [vmem:[#allocation5 + $0x48] sm:$0xff]   ;;  %v3740_v13 = vld [vmem:[#allocation5 + $0x50] sm:$0xff]   ;;  %s2717_s5 = sshll.u32 %s4540_s23, 4  ;;  %s4136_s19 = smov [#allocation10]   ;;  %s4865_s5 = int_to_ptr.vmem [resolvable:$true] %s2717_s5 }
  0x8c   : > { %1147 = vmatpush1.bf16.msra.mxu0 %v3731_v2  ;;  %3628 = vmatpush1.bf16.msra.mxu1 %v3731_v2  ;;  %v3741_v14 = vld [vmem:[#allocation5 + $0x58] sm:$0xff]   ;;  %v3742_v15 = vld [vmem:[#allocation5 + $0x60] sm:$0xff]   ;;  %v3743_v16 = vld [vmem:[#allocation5 + $0x68] sm:$0xff]   ;;  %s4051_s30 = scalar_lea.vmem %s4865_s5, 8064  ;;  %s4055_s24 = sshll.u32 %s4136_s19, 4  ;;  %s4056_s24 = int_to_ptr.vmem [resolvable:$false] %s4055_s24 }
  0x8d   : > { %1148 = vmatprep.subr.bf16.mxu0 %v4135_v0  ;;  %3613 = vmatprep.subr.bf16.mxu1 %v4135_v0  ;;  %v3744_v17 = vld [vmem:[#allocation5 + $0x70] sm:$0xff]   ;;  %v3745_v18 = vld [vmem:[#allocation5 + $0x78] sm:$0xff]   ;;  %p4052_p0 = scmp.ne.s32.totalorder %s4865_s5, %s4051_s30  ;;  %s4057_s27 = scalar_lea.vmem %s4056_s24, 16128 }
  0x8e   : > { %v3754_v23 = vld [vmem:[%s4361_s26 + $0x10] ss:$8 sps:$4 sm:$0xff]   ;;  %v3758_v25 = vld [vmem:[%s4361_s26 + $0x24] ss:$8 sps:$4 sm:$0xff]   ;;  %v3760_v27 = vld [vmem:[%s4361_s26 + $0x20] ss:$8 sps:$4 sm:$0xff]   ;;  %p4058_p11 = scmp.lt.s32.totalorder %s4865_s5, %s4056_s24  ;;  %p4059_p2 = scmp.lt.s32.totalorder %s4057_s27, %s4051_s30 }
  0x8f   : > { %v3757_v24 = vld [vmem:[%s4361_s26 + $0x210] ss:$8 sps:$4 sm:$0xff]   ;;  %v3761_v26 = vld [vmem:[%s4361_s26 + $0x224] ss:$8 sps:$4 sm:$0xff]   ;;  %v3763_v28 = vld [vmem:[%s4361_s26 + $0x220] ss:$8 sps:$4 sm:$0xff]   ;;  %p4053_p3 = pnand %p4052_p0, %p4309_p5 }
  0x90   : > { %1149 = vmatpush1.bf16.msra.mxu0 %v3732_v3  ;;  %3629 = vmatpush1.bf16.msra.mxu1 %v3732_v3  ;;  %v3764_v29 = vld [vmem:[%s4361_s26 + $0x34] ss:$8 sps:$4 sm:$0xff]   ;;  %v3766_v31 = vld [vmem:[%s4361_s26 + $0x30] ss:$8 sps:$4 sm:$0xff]   ;;  %v3770_v33 = vld [vmem:[%s4361_s26 + $0x44] ss:$8 sps:$4 sm:$0xff]   ;;  %p4060_p1 = por %p4059_p2, %p4058_p11 }
  0x91   : > { %1150 = vmatprep.subr.bf16.mxu0 %v4135_v0  ;;  %3614 = vmatprep.subr.bf16.mxu1 %v4135_v0  ;;  %v3767_v30 = vld [vmem:[%s4361_s26 + $0x234] ss:$8 sps:$4 sm:$0xff]   ;;  %v3769_v32 = vld [vmem:[%s4361_s26 + $0x230] ss:$8 sps:$4 sm:$0xff]   ;;  %v3773_v34 = vld [vmem:[%s4361_s26 + $0x244] ss:$8 sps:$4 sm:$0xff]   ;;  %p4054_p7 = pneg %p4053_p3 }
  0x92   : > { %v3772_v35 = vld [vmem:[%s4361_s26 + $0x40] ss:$8 sps:$4 sm:$0xff]   ;;  %v3776_v37 = vld [vmem:[%s4361_s26 + $0x54] ss:$8 sps:$4 sm:$0xff]   ;;  %v3778_v39 = vld [vmem:[%s4361_s26 + $0x50] ss:$8 sps:$4 sm:$0xff]  }
  0x93   : > { %v3775_v36 = vld [vmem:[%s4361_s26 + $0x240] ss:$8 sps:$4 sm:$0xff]   ;;  %v3779_v38 = vld [vmem:[%s4361_s26 + $0x254] ss:$8 sps:$4 sm:$0xff]   ;;  %v3781_v40 = vld [vmem:[%s4361_s26 + $0x250] ss:$8 sps:$4 sm:$0xff]   ;;  %p4061_p4 = pnand %p4060_p1, %p4054_p7 }
  0x94   : > { %1151 = vmatpush1.bf16.msra.mxu0 %v3733_v4  ;;  %3630 = vmatpush1.bf16.msra.mxu1 %v3733_v4  ;;  %v3782_v41 = vld [vmem:[%s4361_s26 + $0x64] ss:$8 sps:$4 sm:$0xff]   ;;  %v3784_v43 = vld [vmem:[%s4361_s26 + $0x60] ss:$8 sps:$4 sm:$0xff]   ;;  %v3788_v45 = vld [vmem:[%s4361_s26 + $0x74] ss:$8 sps:$4 sm:$0xff]  }
  0x95   : > { %1152 = vmatprep.subr.bf16.mxu0 %v4135_v0  ;;  %3615 = vmatprep.subr.bf16.mxu1 %v4135_v0  ;;  %v3785_v42 = vld [vmem:[%s4361_s26 + $0x264] ss:$8 sps:$4 sm:$0xff]   ;;  %v3787_v44 = vld [vmem:[%s4361_s26 + $0x260] ss:$8 sps:$4 sm:$0xff]   ;;  %v3791_v46 = vld [vmem:[%s4361_s26 + $0x274] ss:$8 sps:$4 sm:$0xff]  }
  0x96   : > { %v3790_v47 = vld [vmem:[%s4361_s26 + $0x70] ss:$8 sps:$4 sm:$0xff]   ;;  %v3794_v49 = vld [vmem:[%s4361_s26 + $0x84] ss:$8 sps:$4 sm:$0xff]   ;;  %v3796_v51 = vld [vmem:[%s4361_s26 + $0x80] ss:$8 sps:$4 sm:$0xff]  }
  0x97   : > { %v3793_v48 = vld [vmem:[%s4361_s26 + $0x270] ss:$8 sps:$4 sm:$0xff]   ;;  %v3797_v50 = vld [vmem:[%s4361_s26 + $0x284] ss:$8 sps:$4 sm:$0xff]   ;;  %v3799_v52 = vld [vmem:[%s4361_s26 + $0x280] ss:$8 sps:$4 sm:$0xff]  }
  0x98   : > { %1153 = vmatpush1.bf16.msra.mxu0 %v3734_v5  ;;  %3631 = vmatpush1.bf16.msra.mxu1 %v3734_v5  ;;  %v3800_v53 = vld [vmem:[%s4361_s26 + $0x94] ss:$8 sps:$4 sm:$0xff]   ;;  %v3802_v55 = vld [vmem:[%s4361_s26 + $0x90] ss:$8 sps:$4 sm:$0xff]   ;;  %v3806_v57 = vld [vmem:[%s4361_s26 + $0xa4] ss:$8 sps:$4 sm:$0xff]  }
  0x99   : > { %1154 = vmatprep.subr.bf16.mxu0 %v4135_v0  ;;  %3616 = vmatprep.subr.bf16.mxu1 %v4135_v0  ;;  %v3803_v54 = vld [vmem:[%s4361_s26 + $0x294] ss:$8 sps:$4 sm:$0xff]   ;;  %v3805_v56 = vld [vmem:[%s4361_s26 + $0x290] ss:$8 sps:$4 sm:$0xff]   ;;  %v3809_v58 = vld [vmem:[%s4361_s26 + $0x2a4] ss:$8 sps:$4 sm:$0xff]  }
  0x9a   : > { %v3808_v59 = vld [vmem:[%s4361_s26 + $0xa0] ss:$8 sps:$4 sm:$0xff]   ;;  %v3812_v61 = vld [vmem:[%s4361_s26 + $0xb4] ss:$8 sps:$4 sm:$0xff]   ;;  %v3814_v63 = vld [vmem:[%s4361_s26 + $0xb0] ss:$8 sps:$4 sm:$0xff]  }
  0x9b   : > { %v3811_v60 = vld [vmem:[%s4361_s26 + $0x2a0] ss:$8 sps:$4 sm:$0xff]   ;;  %v3815_v62 = vld [vmem:[%s4361_s26 + $0x2b4] ss:$8 sps:$4 sm:$0xff]   ;;  %v3818_v1 = vld [vmem:[%s4361_s26 + $0xc4] ss:$8 sps:$4 sm:$0xff]  }
  0x9c   : > { %1155 = vmatpush1.bf16.msra.mxu0 %v3735_v7  ;;  %3632 = vmatpush1.bf16.msra.mxu1 %v3735_v7  ;;  %v3821_v2 = vld [vmem:[%s4361_s26 + $0x2c4] ss:$8 sps:$4 sm:$0xff]   ;;  %v3820_v3 = vld [vmem:[%s4361_s26 + $0xc0] ss:$8 sps:$4 sm:$0xff]   ;;  %v3824_v5 = vld [vmem:[%s4361_s26 + $0xd4] ss:$8 sps:$4 sm:$0xff]  }
  0x9d   : > { %1156 = vmatprep.subr.bf16.mxu0 %v4135_v0  ;;  %3617 = vmatprep.subr.bf16.mxu1 %v4135_v0  ;;  %v3823_v4 = vld [vmem:[%s4361_s26 + $0x2c0] ss:$8 sps:$4 sm:$0xff]   ;;  %v3827_v6 = vld [vmem:[%s4361_s26 + $0x2d4] ss:$8 sps:$4 sm:$0xff]   ;;  %v3826_v7 = vld [vmem:[%s4361_s26 + $0xd0] ss:$8 sps:$4 sm:$0xff]  }
  0x9e   : > { %v3829_v8 = vld [vmem:[%s4361_s26 + $0x2d0] ss:$8 sps:$4 sm:$0xff]  }
  0xa0   : > { %1157 = vmatpush1.bf16.msra.mxu0 %v3736_v9  ;;  %3633 = vmatpush1.bf16.msra.mxu1 %v3736_v9  ;;  %v3830_v9 = vld [vmem:[%s4361_s26 + $0xe4] ss:$8 sps:$4 sm:$0xff]  }
  0xa1   : > { %1158 = vmatprep.subr.bf16.mxu0 %v4135_v0  ;;  %3618 = vmatprep.subr.bf16.mxu1 %v4135_v0 }
  0xa4   : > { %1159 = vmatpush1.bf16.msra.mxu0 %v3737_v10  ;;  %3634 = vmatpush1.bf16.msra.mxu1 %v3737_v10  ;;  %v3833_v10 = vld [vmem:[%s4361_s26 + $0x2e4] ss:$8 sps:$4 sm:$0xff]  }
  0xa5   : > { %1160 = vmatprep.subr.bf16.mxu0 %v4135_v0  ;;  %3619 = vmatprep.subr.bf16.mxu1 %v4135_v0 }
  0xa8   : > { %1161 = vmatpush1.bf16.msra.mxu0 %v3738_v11  ;;  %3635 = vmatpush1.bf16.msra.mxu1 %v3738_v11  ;;  %v3832_v11 = vld [vmem:[%s4361_s26 + $0xe0] ss:$8 sps:$4 sm:$0xff]  }
  0xa9   : > { %1162 = vmatprep.subr.bf16.mxu0 %v4135_v0  ;;  %3620 = vmatprep.subr.bf16.mxu1 %v4135_v0 }
  0xac   : > { %1163 = vmatpush1.bf16.msra.mxu0 %v3739_v12  ;;  %3636 = vmatpush1.bf16.msra.mxu1 %v3739_v12  ;;  %v3835_v12 = vld [vmem:[%s4361_s26 + $0x2e0] ss:$8 sps:$4 sm:$0xff]  }
  0xad   : > { %1164 = vmatprep.subr.bf16.mxu0 %v4135_v0  ;;  %3621 = vmatprep.subr.bf16.mxu1 %v4135_v0 }
  0xb0   : > { %1165 = vmatpush1.bf16.msra.mxu0 %v3740_v13  ;;  %3637 = vmatpush1.bf16.msra.mxu1 %v3740_v13  ;;  %v3836_v13 = vld [vmem:[%s4361_s26 + $0xf4] ss:$8 sps:$4 sm:$0xff]  }
  0xb1   : > { %1166 = vmatprep.subr.bf16.mxu0 %v4135_v0  ;;  %3622 = vmatprep.subr.bf16.mxu1 %v4135_v0 }
  0xb4   : > { %1167 = vmatpush1.bf16.msra.mxu0 %v3741_v14  ;;  %3638 = vmatpush1.bf16.msra.mxu1 %v3741_v14  ;;  %v3839_v14 = vld [vmem:[%s4361_s26 + $0x2f4] ss:$8 sps:$4 sm:$0xff]  }
  0xb5   : > { %1168 = vmatprep.subr.bf16.mxu0 %v4135_v0  ;;  %3623 = vmatprep.subr.bf16.mxu1 %v4135_v0 }
  0xb8   : > { %1169 = vmatpush1.bf16.msra.mxu0 %v3742_v15  ;;  %3639 = vmatpush1.bf16.msra.mxu1 %v3742_v15  ;;  %v3838_v15 = vld [vmem:[%s4361_s26 + $0xf0] ss:$8 sps:$4 sm:$0xff]  }
  0xb9   : > { %1170 = vmatprep.subr.bf16.mxu0 %v4135_v0  ;;  %3624 = vmatprep.subr.bf16.mxu1 %v4135_v0 }
  0xbc   : > { %1171 = vmatpush1.bf16.msra.mxu0 %v3743_v16  ;;  %3640 = vmatpush1.bf16.msra.mxu1 %v3743_v16  ;;  %v3841_v16 = vld [vmem:[%s4361_s26 + $0x2f0] ss:$8 sps:$4 sm:$0xff]  }
  0xbd   : > { %1172 = vmatprep.subr.bf16.mxu0 %v4135_v0  ;;  %3625 = vmatprep.subr.bf16.mxu1 %v4135_v0 }
  0xc0   : > { %1173 = vmatpush1.bf16.msra.mxu0 %v3744_v17  ;;  %3641 = vmatpush1.bf16.msra.mxu1 %v3744_v17  ;;  %v3842_v17 = vld [vmem:[%s4361_s26 + $0x104] ss:$8 sps:$4 sm:$0xff]  }
  0xc1   : > { %1174 = vmatprep.subr.bf16.mxu0 %v4135_v0  ;;  %3626 = vmatprep.subr.bf16.mxu1 %v4135_v0  ;;  %v3817_v0 = vld [vmem:[%s4361_s26 + $0x2b0] ss:$8 sps:$4 sm:$0xff]  }
  0xc4   : > { %1175 = vmatpush1.bf16.msra.mxu0 %v3745_v18  ;;  %3642 = vmatpush1.bf16.msra.mxu1 %v3745_v18  ;;  %v3845_v18 = vld [vmem:[%s4361_s26 + $0x304] ss:$8 sps:$4 sm:$0xff]  }
  0xc7   : > { %1177 = vmatmul.mubr.bf16.vlgmr.msra.gmra.mrb[0].mxu0 %v3746_v19  ;;  %1433 = vmatmul.mubr.bf16.vlgmr.msra.gmra.mrb[0].mxu1 %v3749_v20  ;;  %v3844_v19 = vld [vmem:[%s4361_s26 + $0x100] ss:$8 sps:$4 sm:$0xff]  }
  0xc8   : > { %1184 = vmatprep.mubr.bf16.mxu0 %v3752_v21  ;;  %1440 = vmatprep.mubr.bf16.mxu1 %v3755_v22  ;;  %v3847_v20 = vld [vmem:[%s4361_s26 + $0x300] ss:$8 sps:$4 sm:$0xff]   ;;  %v3848_v21 = vld [vmem:[%s4361_s26 + $0x114] ss:$8 sps:$4 sm:$0xff]  }
  0xc9   : > { %v3851_v22 = vld [vmem:[%s4361_s26 + $0x314] ss:$8 sps:$4 sm:$0xff]  }
  0xcf   : > { %1185 = vmatmul.mubr.bf16.gmra.mrb[4].mxu0 %v3754_v23  ;;  %1441 = vmatmul.mubr.bf16.gmra.mrb[4].mxu1 %v3757_v24  ;;  %v3850_v23 = vld [vmem:[%s4361_s26 + $0x110] ss:$8 sps:$4 sm:$0xff]  }
  0xd0   : > { %1192 = vmatprep.mubr.bf16.mxu0 %v3758_v25  ;;  %1448 = vmatprep.mubr.bf16.mxu1 %v3761_v26  ;;  %v3853_v24 = vld [vmem:[%s4361_s26 + $0x310] ss:$8 sps:$4 sm:$0xff]   ;;  %v3854_v25 = vld [vmem:[%s4361_s26 + $0x124] ss:$8 sps:$4 sm:$0xff]  }
  0xd1   : > { %v3857_v26 = vld [vmem:[%s4361_s26 + $0x324] ss:$8 sps:$4 sm:$0xff]  }
  0xd7   : > { %1193 = vmatmul.mubr.bf16.gmra.mrb[8].mxu0 %v3760_v27  ;;  %1449 = vmatmul.mubr.bf16.gmra.mrb[8].mxu1 %v3763_v28  ;;  %v3856_v27 = vld [vmem:[%s4361_s26 + $0x120] ss:$8 sps:$4 sm:$0xff]  }
  0xd8   : > { %1200 = vmatprep.mubr.bf16.mxu0 %v3764_v29  ;;  %1456 = vmatprep.mubr.bf16.mxu1 %v3767_v30  ;;  %v3859_v28 = vld [vmem:[%s4361_s26 + $0x320] ss:$8 sps:$4 sm:$0xff]   ;;  %v3860_v29 = vld [vmem:[%s4361_s26 + $0x134] ss:$8 sps:$4 sm:$0xff]  }
  0xd9   : > { %v3863_v30 = vld [vmem:[%s4361_s26 + $0x334] ss:$8 sps:$4 sm:$0xff]  }
  0xdf   : > { %1201 = vmatmul.mubr.bf16.gmra.mrb[12].mxu0 %v3766_v31  ;;  %1457 = vmatmul.mubr.bf16.gmra.mrb[12].mxu1 %v3769_v32  ;;  %v3862_v31 = vld [vmem:[%s4361_s26 + $0x130] ss:$8 sps:$4 sm:$0xff]  }
  0xe0   : > { %1208 = vmatprep.mubr.bf16.mxu0 %v3770_v33  ;;  %1464 = vmatprep.mubr.bf16.mxu1 %v3773_v34  ;;  %v3865_v32 = vld [vmem:[%s4361_s26 + $0x330] ss:$8 sps:$4 sm:$0xff]   ;;  %v3866_v33 = vld [vmem:[%s4361_s26 + $0x144] ss:$8 sps:$4 sm:$0xff]  }
  0xe1   : > { %v3869_v34 = vld [vmem:[%s4361_s26 + $0x344] ss:$8 sps:$4 sm:$0xff]  }
  0xe7   : > { %1209 = vmatmul.mubr.bf16.gmra.mrb[16].mxu0 %v3772_v35  ;;  %1465 = vmatmul.mubr.bf16.gmra.mrb[16].mxu1 %v3775_v36  ;;  %v3868_v35 = vld [vmem:[%s4361_s26 + $0x140] ss:$8 sps:$4 sm:$0xff]  }
  0xe8   : > { %1216 = vmatprep.mubr.bf16.mxu0 %v3776_v37  ;;  %1472 = vmatprep.mubr.bf16.mxu1 %v3779_v38  ;;  %v3871_v36 = vld [vmem:[%s4361_s26 + $0x340] ss:$8 sps:$4 sm:$0xff]   ;;  %v3872_v37 = vld [vmem:[%s4361_s26 + $0x154] ss:$8 sps:$4 sm:$0xff]  }
  0xe9   : > { %v3875_v38 = vld [vmem:[%s4361_s26 + $0x354] ss:$8 sps:$4 sm:$0xff]  }
  0xef   : > { %1217 = vmatmul.mubr.bf16.gmra.mrb[20].mxu0 %v3778_v39  ;;  %1473 = vmatmul.mubr.bf16.gmra.mrb[20].mxu1 %v3781_v40  ;;  %v3874_v39 = vld [vmem:[%s4361_s26 + $0x150] ss:$8 sps:$4 sm:$0xff]  }
  0xf0   : > { %1224 = vmatprep.mubr.bf16.mxu0 %v3782_v41  ;;  %1480 = vmatprep.mubr.bf16.mxu1 %v3785_v42  ;;  %v3877_v40 = vld [vmem:[%s4361_s26 + $0x350] ss:$8 sps:$4 sm:$0xff]   ;;  %v3878_v41 = vld [vmem:[%s4361_s26 + $0x164] ss:$8 sps:$4 sm:$0xff]  }
  0xf1   : > { %v3881_v42 = vld [vmem:[%s4361_s26 + $0x364] ss:$8 sps:$4 sm:$0xff]  }
  0xf7   : > { %1225 = vmatmul.mubr.bf16.gmra.mrb[24].mxu0 %v3784_v43  ;;  %1481 = vmatmul.mubr.bf16.gmra.mrb[24].mxu1 %v3787_v44  ;;  %v3880_v43 = vld [vmem:[%s4361_s26 + $0x160] ss:$8 sps:$4 sm:$0xff]  }
  0xf8   : > { %1232 = vmatprep.mubr.bf16.mxu0 %v3788_v45  ;;  %1488 = vmatprep.mubr.bf16.mxu1 %v3791_v46  ;;  %v3883_v44 = vld [vmem:[%s4361_s26 + $0x360] ss:$8 sps:$4 sm:$0xff]   ;;  %v3884_v45 = vld [vmem:[%s4361_s26 + $0x174] ss:$8 sps:$4 sm:$0xff]  }
  0xf9   : > { %v3887_v46 = vld [vmem:[%s4361_s26 + $0x374] ss:$8 sps:$4 sm:$0xff]  }
  0xff   : > { %1233 = vmatmul.mubr.bf16.gmra.mrb[28].mxu0 %v3790_v47  ;;  %1489 = vmatmul.mubr.bf16.gmra.mrb[28].mxu1 %v3793_v48  ;;  %v3886_v47 = vld [vmem:[%s4361_s26 + $0x170] ss:$8 sps:$4 sm:$0xff]  }
 0x100   : > { %1240 = vmatprep.mubr.bf16.mxu0 %v3794_v49  ;;  %1496 = vmatprep.mubr.bf16.mxu1 %v3797_v50  ;;  %v3889_v48 = vld [vmem:[%s4361_s26 + $0x370] ss:$8 sps:$4 sm:$0xff]   ;;  %v3890_v49 = vld [vmem:[%s4361_s26 + $0x184] ss:$8 sps:$4 sm:$0xff]  }
 0x101   : > { %v3893_v50 = vld [vmem:[%s4361_s26 + $0x384] ss:$8 sps:$4 sm:$0xff]  }
 0x107   : > { %1241 = vmatmul.mubr.bf16.gmra.mrb[32].mxu0 %v3796_v51  ;;  %1497 = vmatmul.mubr.bf16.gmra.mrb[32].mxu1 %v3799_v52  ;;  %v3892_v51 = vld [vmem:[%s4361_s26 + $0x180] ss:$8 sps:$4 sm:$0xff]  }
 0x108   : > { %1248 = vmatprep.mubr.bf16.mxu0 %v3800_v53  ;;  %1504 = vmatprep.mubr.bf16.mxu1 %v3803_v54  ;;  %v3895_v52 = vld [vmem:[%s4361_s26 + $0x380] ss:$8 sps:$4 sm:$0xff]   ;;  %v3896_v53 = vld [vmem:[%s4361_s26 + $0x194] ss:$8 sps:$4 sm:$0xff]  }
 0x109   : > { %v3899_v54 = vld [vmem:[%s4361_s26 + $0x394] ss:$8 sps:$4 sm:$0xff]  }
 0x10f   : > { %1249 = vmatmul.mubr.bf16.gmra.mrb[36].mxu0 %v3802_v55  ;;  %1505 = vmatmul.mubr.bf16.gmra.mrb[36].mxu1 %v3805_v56  ;;  %v3898_v55 = vld [vmem:[%s4361_s26 + $0x190] ss:$8 sps:$4 sm:$0xff]  }
 0x110   : > { %1256 = vmatprep.mubr.bf16.mxu0 %v3806_v57  ;;  %1512 = vmatprep.mubr.bf16.mxu1 %v3809_v58  ;;  %v3901_v56 = vld [vmem:[%s4361_s26 + $0x390] ss:$8 sps:$4 sm:$0xff]   ;;  %v3902_v57 = vld [vmem:[%s4361_s26 + $0x1a4] ss:$8 sps:$4 sm:$0xff]  }
 0x111   : > { %v3905_v58 = vld [vmem:[%s4361_s26 + $0x3a4] ss:$8 sps:$4 sm:$0xff]  }
 0x117   : > { %1257 = vmatmul.mubr.bf16.gmra.mrb[40].mxu0 %v3808_v59  ;;  %1513 = vmatmul.mubr.bf16.gmra.mrb[40].mxu1 %v3811_v60  ;;  %v3904_v59 = vld [vmem:[%s4361_s26 + $0x1a0] ss:$8 sps:$4 sm:$0xff]  }
 0x118   : > { %1264 = vmatprep.mubr.bf16.mxu0 %v3812_v61  ;;  %1520 = vmatprep.mubr.bf16.mxu1 %v3815_v62  ;;  %v3907_v60 = vld [vmem:[%s4361_s26 + $0x3a0] ss:$8 sps:$4 sm:$0xff]   ;;  %v3908_v61 = vld [vmem:[%s4361_s26 + $0x1b4] ss:$8 sps:$4 sm:$0xff]  }
 0x119   : > { %v3911_v62 = vld [vmem:[%s4361_s26 + $0x3b4] ss:$8 sps:$4 sm:$0xff]  }
 0x11f   : > { %1265 = vmatmul.mubr.bf16.gmra.mrb[44].mxu0 %v3814_v63  ;;  %1521 = vmatmul.mubr.bf16.gmra.mrb[44].mxu1 %v3817_v0  ;;  %v4517_v63 = vld [vmem:[#allocation7] ss:$0 sm:$0xff] }
 0x120   : > { %1272 = vmatprep.mubr.bf16.mxu0 %v3818_v1  ;;  %1528 = vmatprep.mubr.bf16.mxu1 %v3821_v2  ;;  %v4519_v1 = vld [vmem:[#allocation8] ss:$0 sm:$0xff] }
 0x127   : > { %1273 = vmatmul.mubr.bf16.gmra.mrb[48].mxu0 %v3820_v3  ;;  %1529 = vmatmul.mubr.bf16.gmra.mrb[48].mxu1 %v3823_v4 }
 0x128   : > { %1280 = vmatprep.mubr.bf16.mxu0 %v3824_v5  ;;  %1536 = vmatprep.mubr.bf16.mxu1 %v3827_v6  ;;  %v3910_v5 = vld [vmem:[%s4361_s26 + $0x1b0] ss:$8 sps:$4 sm:$0xff]  }
 0x12f   : > { %1281 = vmatmul.mubr.bf16.gmra.mrb[52].mxu0 %v3826_v7  ;;  %1537 = vmatmul.mubr.bf16.gmra.mrb[52].mxu1 %v3829_v8  ;;  %v3913_v8 = vld [vmem:[%s4361_s26 + $0x3b0] ss:$8 sps:$4 sm:$0xff]  }
 0x130   : > { %1288 = vmatprep.mubr.bf16.mxu0 %v3830_v9  ;;  %1544 = vmatprep.mubr.bf16.mxu1 %v3833_v10 }
 0x137   : > { %1289 = vmatmul.mubr.bf16.gmra.mrb[56].mxu0 %v3832_v11  ;;  %1545 = vmatmul.mubr.bf16.gmra.mrb[56].mxu1 %v3835_v12  ;;  %v3914_v11 = vld [vmem:[%s4361_s26 + $0x1c4] ss:$8 sps:$4 sm:$0xff]  }
 0x138   : > { %1296 = vmatprep.mubr.bf16.mxu0 %v3836_v13  ;;  %1552 = vmatprep.mubr.bf16.mxu1 %v3839_v14  ;;  %v3917_v12 = vld [vmem:[%s4361_s26 + $0x3c4] ss:$8 sps:$4 sm:$0xff]  }
 0x13f   : > { %1297 = vmatmul.mubr.bf16.gmra.mrb[60].mxu0 %v3838_v15  ;;  %1553 = vmatmul.mubr.bf16.gmra.mrb[60].mxu1 %v3841_v16 }
 0x140   : > { %1304 = vmatprep.mubr.bf16.mxu0 %v3842_v17  ;;  %1560 = vmatprep.mubr.bf16.mxu1 %v3845_v18 }
 0x147   : > { %1305 = vmatmul.mubr.bf16.gmra.mrb[64].mxu0 %v3844_v19  ;;  %1561 = vmatmul.mubr.bf16.gmra.mrb[64].mxu1 %v3847_v20 }
 0x148   : > { %1312 = vmatprep.mubr.bf16.mxu0 %v3848_v21  ;;  %1568 = vmatprep.mubr.bf16.mxu1 %v3851_v22 }
 0x14f   : > { %1313 = vmatmul.mubr.bf16.gmra.mrb[68].mxu0 %v3850_v23  ;;  %1569 = vmatmul.mubr.bf16.gmra.mrb[68].mxu1 %v3853_v24 }
 0x150   : > { %1320 = vmatprep.mubr.bf16.mxu0 %v3854_v25  ;;  %1576 = vmatprep.mubr.bf16.mxu1 %v3857_v26 }
 0x157   : > { %1321 = vmatmul.mubr.bf16.gmra.mrb[72].mxu0 %v3856_v27  ;;  %1577 = vmatmul.mubr.bf16.gmra.mrb[72].mxu1 %v3859_v28 }
 0x158   : > { %1328 = vmatprep.mubr.bf16.mxu0 %v3860_v29  ;;  %1584 = vmatprep.mubr.bf16.mxu1 %v3863_v30 }
 0x15f   : > { %1329 = vmatmul.mubr.bf16.gmra.mrb[76].mxu0 %v3862_v31  ;;  %1585 = vmatmul.mubr.bf16.gmra.mrb[76].mxu1 %v3865_v32  ;;  %v3916_v31 = vld [vmem:[%s4361_s26 + $0x1c0] ss:$8 sps:$4 sm:$0xff]  }
 0x160   : > { %1336 = vmatprep.mubr.bf16.mxu0 %v3866_v33  ;;  %1592 = vmatprep.mubr.bf16.mxu1 %v3869_v34  ;;  %v3919_v34 = vld [vmem:[%s4361_s26 + $0x3c0] ss:$8 sps:$4 sm:$0xff]  }
 0x167   : > { %1337 = vmatmul.mubr.bf16.gmra.mrb[80].mxu0 %v3868_v35  ;;  %1593 = vmatmul.mubr.bf16.gmra.mrb[80].mxu1 %v3871_v36 }
 0x168   : > { %1344 = vmatprep.mubr.bf16.mxu0 %v3872_v37  ;;  %1600 = vmatprep.mubr.bf16.mxu1 %v3875_v38  ;;  %v3920_v37 = vld [vmem:[%s4361_s26 + $0x1d4] ss:$8 sps:$4 sm:$0xff]  }
 0x169   : > { %v3923_v38 = vld [vmem:[%s4361_s26 + $0x3d4] ss:$8 sps:$4 sm:$0xff]  }
 0x16f   : > { %1345 = vmatmul.mubr.bf16.gmra.mrb[84].mxu0 %v3874_v39  ;;  %1601 = vmatmul.mubr.bf16.gmra.mrb[84].mxu1 %v3877_v40 }
 0x170   : > { %1352 = vmatprep.mubr.bf16.mxu0 %v3878_v41  ;;  %1608 = vmatprep.mubr.bf16.mxu1 %v3881_v42 }
 0x177   : > { %1353 = vmatmul.mubr.bf16.gmra.mrb[88].mxu0 %v3880_v43  ;;  %1609 = vmatmul.mubr.bf16.gmra.mrb[88].mxu1 %v3883_v44 }
 0x178   : > { %1360 = vmatprep.mubr.bf16.mxu0 %v3884_v45  ;;  %1616 = vmatprep.mubr.bf16.mxu1 %v3887_v46 }
 0x17f   : > { %1361 = vmatmul.mubr.bf16.gmra.mrb[92].mxu0 %v3886_v47  ;;  %1617 = vmatmul.mubr.bf16.gmra.mrb[92].mxu1 %v3889_v48 }
 0x180   : > { %1368 = vmatprep.mubr.bf16.mxu0 %v3890_v49  ;;  %1624 = vmatprep.mubr.bf16.mxu1 %v3893_v50 }
 0x187   : > { %1369 = vmatmul.mubr.bf16.gmra.mrb[96].mxu0 %v3892_v51  ;;  %1625 = vmatmul.mubr.bf16.gmra.mrb[96].mxu1 %v3895_v52 }
 0x188   : > { %1376 = vmatprep.mubr.bf16.mxu0 %v3896_v53  ;;  %1632 = vmatprep.mubr.bf16.mxu1 %v3899_v54 }
 0x18f   : > { %1377 = vmatmul.mubr.bf16.gmra.mrb[100].mxu0 %v3898_v55  ;;  %1633 = vmatmul.mubr.bf16.gmra.mrb[100].mxu1 %v3901_v56 }
 0x190   : > { %1384 = vmatprep.mubr.bf16.mxu0 %v3902_v57  ;;  %1640 = vmatprep.mubr.bf16.mxu1 %v3905_v58  ;;  %v3922_v57 = vld [vmem:[%s4361_s26 + $0x1d0] ss:$8 sps:$4 sm:$0xff]  }
 0x197   : > { %1385 = vmatmul.mubr.bf16.gmra.mrb[104].mxu0 %v3904_v59  ;;  %1641 = vmatmul.mubr.bf16.gmra.mrb[104].mxu1 %v3907_v60  ;;  %v3925_v60 = vld [vmem:[%s4361_s26 + $0x3d0] ss:$8 sps:$4 sm:$0xff]  }
 0x198   : > { %1392 = vmatprep.mubr.bf16.mxu0 %v3908_v61  ;;  %1648 = vmatprep.mubr.bf16.mxu1 %v3911_v62 }
 0x19a   : > { %v1178_v0 = vpop.f32.mrb[0].mxu0  ;;  %v1434_v2 = vpop.f32.mrb[0].mxu1 }
 0x19b   : > { %v1688_v3 = vmul.f32 %v4517_v63, %v1178_v0  ;;  %v1180_v4 = vpop.f32.mrb[1].mxu0  ;;  %v1752_v6 = vmul.f32 %v4517_v63, %v1434_v2  ;;  %v1436_v7 = vpop.f32.mrb[1].mxu1  ;;  %v3926_v0 = vld [vmem:[%s4361_s26 + $0x1e4] ss:$8 sps:$4 sm:$0xff]  }
 0x19c   : > { %v1181_v9 = vpop.f32.mrb[2].mxu0  ;;  %v1437_v10 = vpop.f32.mrb[2].mxu1  ;;  %v3929_v2 = vld [vmem:[%s4361_s26 + $0x3e4] ss:$8 sps:$4 sm:$0xff]  }
 0x19d   : > { %v1821_v13 = vadd.f32 %v4519_v1, %v1688_v3  ;;  %v1689_v14 = vmul.f32 %v4517_v63, %v1181_v9  ;;  %v1183_v15 = vpop.f32.mrb[3].mxu0  ;;  %v1885_v16 = vadd.f32 %v4519_v1, %v1752_v6  ;;  %v1753_v17 = vmul.f32 %v4517_v63, %v1437_v10  ;;  %v1439_v18 = vpop.f32.mrb[3].mxu1 }
 0x19f   : > { %v1822_v19 = vadd.f32 %v4519_v1, %v1689_v14  ;;  %1393 = vmatmul.mubr.bf16.gmra.mrb[108].mxu0 %v3910_v5  ;;  %v2011_v20 = vmax.f32 %v1885_v16, 0.0  ;;  %v1886_v21 = vadd.f32 %v4519_v1, %v1753_v17  ;;  %1649 = vmatmul.mubr.bf16.gmra.mrb[108].mxu1 %v3913_v8  ;;  %v1947_v22 = vmax.f32 %v1821_v13, 0.0 }
 0x1a0   : > { %1400 = vmatprep.mubr.bf16.mxu0 %v3914_v11  ;;  %1656 = vmatprep.mubr.bf16.mxu1 %v3917_v12 }
 0x1a1   : > { %v1948_v23 = vmax.f32 %v1822_v19, 0.0  ;;  %v2012_v24 = vmax.f32 %v1886_v21, 0.0  ;;  %v3928_v21 = vld [vmem:[%s4361_s26 + $0x1e0] ss:$8 sps:$4 sm:$0xff]  }
 0x1a2   : > { %v1186_v25 = vpop.f32.mrb[4].mxu0  ;;  %v1442_v26 = vpop.f32.mrb[4].mxu1 }
 0x1a3   : > { %v3236_v27 = vpack.c.bf16 %v1948_v23, %v1947_v22  ;;  %v3396_v28 = vpack.c.bf16 %v2012_v24, %v2011_v20  ;;  %v1690_v29 = vmul.f32 %v4517_v63, %v1186_v25  ;;  %v1188_v30 = vpop.f32.mrb[5].mxu0  ;;  %v1754_v32 = vmul.f32 %v4517_v63, %v1442_v26  ;;  %v1444_v33 = vpop.f32.mrb[5].mxu1  ;;  %v3931_v24 = vld [vmem:[%s4361_s26 + $0x3e0] ss:$8 sps:$4 sm:$0xff]  }
 0x1a4   : > { %v1189_v35 = vpop.f32.mrb[6].mxu0  ;;  %v1445_v36 = vpop.f32.mrb[6].mxu1 }
 0x1a5   : > { %3237 = vst [vmem:[%s4540_s23] sm:$0xff] %v3236_v27   ;;  %3580 = vst [vmem:[%s4540_s23 + $0x100] sm:$0xff] %v3396_v28   ;;  %v1823_v39 = vadd.f32 %v4519_v1, %v1690_v29  ;;  %v1691_v40 = vmul.f32 %v4517_v63, %v1189_v35  ;;  %v1191_v41 = vpop.f32.mrb[7].mxu0  ;;  %v1887_v42 = vadd.f32 %v4519_v1, %v1754_v32  ;;  %v1447_v44 = vpop.f32.mrb[7].mxu1  ;;  %v3932_v27 = vld [vmem:[%s4361_s26 + $0x1f4] ss:$8 sps:$4 sm:$0xff]  }
 0x1a6   : > { %v1755_v43 = vmul.f32 %v4517_v63, %v1445_v36 }
 0x1a7   : > { %v1824_v45 = vadd.f32 %v4519_v1, %v1691_v40  ;;  %1401 = vmatmul.mubr.bf16.gmra.mrb[112].mxu0 %v3916_v31  ;;  %v2013_v46 = vmax.f32 %v1887_v42, 0.0  ;;  %1657 = vmatmul.mubr.bf16.gmra.mrb[112].mxu1 %v3919_v34  ;;  %v1949_v48 = vmax.f32 %v1823_v39, 0.0 }
 0x1a8   : > { %v1888_v47 = vadd.f32 %v4519_v1, %v1755_v43  ;;  %1408 = vmatprep.mubr.bf16.mxu0 %v3920_v37  ;;  %1664 = vmatprep.mubr.bf16.mxu1 %v3923_v38 }
 0x1a9   : > { %v1950_v49 = vmax.f32 %v1824_v45, 0.0 }
 0x1aa   : > { %v2014_v50 = vmax.f32 %v1888_v47, 0.0  ;;  %v1194_v51 = vpop.f32.mrb[8].mxu0  ;;  %v1450_v52 = vpop.f32.mrb[8].mxu1 }
 0x1ab   : > { %v3241_v53 = vpack.c.bf16 %v1950_v49, %v1949_v48  ;;  %v1692_v55 = vmul.f32 %v4517_v63, %v1194_v51  ;;  %v1196_v56 = vpop.f32.mrb[9].mxu0  ;;  %v1756_v58 = vmul.f32 %v4517_v63, %v1450_v52  ;;  %v1452_v59 = vpop.f32.mrb[9].mxu1 }
 0x1ac   : > { %v3401_v54 = vpack.c.bf16 %v2014_v50, %v2013_v46  ;;  %v1197_v61 = vpop.f32.mrb[10].mxu0  ;;  %v1453_v62 = vpop.f32.mrb[10].mxu1  ;;  %v3934_v46 = vld [vmem:[%s4361_s26 + $0x1f0] ss:$8 sps:$4 sm:$0xff]  }
 0x1ad   : > { %3549 = vst [vmem:[%s4540_s23 + $0x8] sm:$0xff] %v3241_v53   ;;  %v1825_v3 = vadd.f32 %v4519_v1, %v1692_v55  ;;  %v1693_v4 = vmul.f32 %v4517_v63, %v1197_v61  ;;  %v1199_v5 = vpop.f32.mrb[11].mxu0  ;;  %v1889_v6 = vadd.f32 %v4519_v1, %v1756_v58  ;;  %v1757_v7 = vmul.f32 %v4517_v63, %v1453_v62  ;;  %v1455_v8 = vpop.f32.mrb[11].mxu1 }
 0x1ae   : > { %3581 = vst [vmem:[%s4540_s23 + $0x108] sm:$0xff] %v3401_v54  }
 0x1af   : > { %v1826_v9 = vadd.f32 %v4519_v1, %v1693_v4  ;;  %1409 = vmatmul.mubr.bf16.gmra.mrb[116].mxu0 %v3922_v57  ;;  %v2015_v10 = vmax.f32 %v1889_v6, 0.0  ;;  %v1890_v11 = vadd.f32 %v4519_v1, %v1757_v7  ;;  %1665 = vmatmul.mubr.bf16.gmra.mrb[116].mxu1 %v3925_v60  ;;  %v1951_v12 = vmax.f32 %v1825_v3, 0.0 }
 0x1b0   : > { %1416 = vmatprep.mubr.bf16.mxu0 %v3926_v0  ;;  %1672 = vmatprep.mubr.bf16.mxu1 %v3929_v2 }
 0x1b1   : > { %v1952_v13 = vmax.f32 %v1826_v9, 0.0  ;;  %v2016_v14 = vmax.f32 %v1890_v11, 0.0 }
 0x1b2   : > { %v1202_v15 = vpop.f32.mrb[12].mxu0  ;;  %v1458_v16 = vpop.f32.mrb[12].mxu1 }
 0x1b3   : > { %v3246_v17 = vpack.c.bf16 %v1952_v13, %v1951_v12  ;;  %v3406_v18 = vpack.c.bf16 %v2016_v14, %v2015_v10  ;;  %v1694_v19 = vmul.f32 %v4517_v63, %v1202_v15  ;;  %v1204_v20 = vpop.f32.mrb[13].mxu0  ;;  %v1758_v22 = vmul.f32 %v4517_v63, %v1458_v16  ;;  %v1460_v23 = vpop.f32.mrb[13].mxu1 }
 0x1b4   : > { %v1205_v25 = vpop.f32.mrb[14].mxu0  ;;  %v1461_v26 = vpop.f32.mrb[14].mxu1 }
 0x1b5   : > { %3550 = vst [vmem:[%s4540_s23 + $0x10] sm:$0xff] %v3246_v17   ;;  %3582 = vst [vmem:[%s4540_s23 + $0x110] sm:$0xff] %v3406_v18   ;;  %v1827_v28 = vadd.f32 %v4519_v1, %v1694_v19  ;;  %v1695_v29 = vmul.f32 %v4517_v63, %v1205_v25  ;;  %v1207_v30 = vpop.f32.mrb[15].mxu0  ;;  %v1891_v31 = vadd.f32 %v4519_v1, %v1758_v22  ;;  %v1463_v33 = vpop.f32.mrb[15].mxu1 }
 0x1b6   : > { %v1759_v32 = vmul.f32 %v4517_v63, %v1461_v26 }
 0x1b7   : > { %v1828_v34 = vadd.f32 %v4519_v1, %v1695_v29  ;;  %1417 = vmatmul.mubr.bf16.gmra.mrb[120].mxu0 %v3928_v21  ;;  %v2017_v35 = vmax.f32 %v1891_v31, 0.0  ;;  %1673 = vmatmul.mubr.bf16.gmra.mrb[120].mxu1 %v3931_v24  ;;  %v1953_v37 = vmax.f32 %v1827_v28, 0.0 }
 0x1b8   : > { %v1892_v36 = vadd.f32 %v4519_v1, %v1759_v32  ;;  %1424 = vmatprep.mubr.bf16.mxu0 %v3932_v27 }
 0x1b9   : > { %v1954_v38 = vmax.f32 %v1828_v34, 0.0 }
 0x1ba   : > { %v2018_v39 = vmax.f32 %v1892_v36, 0.0  ;;  %v1210_v40 = vpop.f32.mrb[16].mxu0  ;;  %v1466_v41 = vpop.f32.mrb[16].mxu1 }
 0x1bb   : > { %v3251_v42 = vpack.c.bf16 %v1954_v38, %v1953_v37  ;;  %v1696_v44 = vmul.f32 %v4517_v63, %v1210_v40  ;;  %v1212_v45 = vpop.f32.mrb[17].mxu0  ;;  %v1760_v47 = vmul.f32 %v4517_v63, %v1466_v41  ;;  %v1468_v48 = vpop.f32.mrb[17].mxu1 }
 0x1bc   : > { %v3411_v43 = vpack.c.bf16 %v2018_v39, %v2017_v35  ;;  %v1213_v49 = vpop.f32.mrb[18].mxu0  ;;  %v1469_v50 = vpop.f32.mrb[18].mxu1 }
 0x1bd   : > { %3551 = vst [vmem:[%s4540_s23 + $0x18] sm:$0xff] %v3251_v42   ;;  %v1829_v51 = vadd.f32 %v4519_v1, %v1696_v44  ;;  %v1697_v52 = vmul.f32 %v4517_v63, %v1213_v49  ;;  %v1215_v53 = vpop.f32.mrb[19].mxu0  ;;  %v1893_v54 = vadd.f32 %v4519_v1, %v1760_v47  ;;  %v1761_v55 = vmul.f32 %v4517_v63, %v1469_v50  ;;  %v1471_v56 = vpop.f32.mrb[19].mxu1 }
 0x1be   : > { %3583 = vst [vmem:[%s4540_s23 + $0x118] sm:$0xff] %v3411_v43  }
 0x1bf   : > { %v1830_v57 = vadd.f32 %v4519_v1, %v1697_v52  ;;  %1425 = vmatmul.mubr.bf16.gmra.mrb[124].mxu0 %v3934_v46  ;;  %v2019_v58 = vmax.f32 %v1893_v54, 0.0  ;;  %v1894_v59 = vadd.f32 %v4519_v1, %v1761_v55  ;;  %v1955_v60 = vmax.f32 %v1829_v51, 0.0 }
 0x1c1   : > { %v1956_v61 = vmax.f32 %v1830_v57, 0.0  ;;  %v2020_v62 = vmax.f32 %v1894_v59, 0.0 }
 0x1c2   : > { %v1218_v0 = vpop.f32.mrb[20].mxu0  ;;  %v1474_v2 = vpop.f32.mrb[20].mxu1 }
 0x1c3   : > { %v3256_v3 = vpack.c.bf16 %v1956_v61, %v1955_v60  ;;  %v3416_v4 = vpack.c.bf16 %v2020_v62, %v2019_v58  ;;  %v1698_v5 = vmul.f32 %v4517_v63, %v1218_v0  ;;  %v1220_v6 = vpop.f32.mrb[21].mxu0  ;;  %v1762_v7 = vmul.f32 %v4517_v63, %v1474_v2  ;;  %v1476_v8 = vpop.f32.mrb[21].mxu1 }
 0x1c4   : > { %v1221_v9 = vpop.f32.mrb[22].mxu0  ;;  %v1477_v10 = vpop.f32.mrb[22].mxu1 }
 0x1c5   : > { %3552 = vst [vmem:[%s4540_s23 + $0x20] sm:$0xff] %v3256_v3   ;;  %3584 = vst [vmem:[%s4540_s23 + $0x120] sm:$0xff] %v3416_v4   ;;  %v1831_v11 = vadd.f32 %v4519_v1, %v1698_v5  ;;  %v1699_v12 = vmul.f32 %v4517_v63, %v1221_v9  ;;  %v1223_v13 = vpop.f32.mrb[23].mxu0  ;;  %v1895_v14 = vadd.f32 %v4519_v1, %v1762_v7  ;;  %v1479_v16 = vpop.f32.mrb[23].mxu1 }
 0x1c6   : > { %v1763_v15 = vmul.f32 %v4517_v63, %v1477_v10 }
 0x1c7   : > { %v1832_v17 = vadd.f32 %v4519_v1, %v1699_v12  ;;  %v2021_v18 = vmax.f32 %v1895_v14, 0.0  ;;  %v1957_v20 = vmax.f32 %v1831_v11, 0.0 }
 0x1c8   : > { %v1896_v19 = vadd.f32 %v4519_v1, %v1763_v15 }
 0x1c9   : > { %v1958_v21 = vmax.f32 %v1832_v17, 0.0 }
 0x1ca   : > { %v2022_v22 = vmax.f32 %v1896_v19, 0.0  ;;  %v1226_v23 = vpop.f32.mrb[24].mxu0  ;;  %v1482_v24 = vpop.f32.mrb[24].mxu1 }
 0x1cb   : > { %v3261_v25 = vpack.c.bf16 %v1958_v21, %v1957_v20  ;;  %v1700_v27 = vmul.f32 %v4517_v63, %v1226_v23  ;;  %v1228_v28 = vpop.f32.mrb[25].mxu0  ;;  %v1764_v29 = vmul.f32 %v4517_v63, %v1482_v24  ;;  %v1484_v30 = vpop.f32.mrb[25].mxu1 }
 0x1cc   : > { %v3421_v26 = vpack.c.bf16 %v2022_v22, %v2021_v18  ;;  %v1229_v31 = vpop.f32.mrb[26].mxu0  ;;  %v1485_v32 = vpop.f32.mrb[26].mxu1 }
 0x1cd   : > { %3553 = vst [vmem:[%s4540_s23 + $0x28] sm:$0xff] %v3261_v25   ;;  %v1833_v33 = vadd.f32 %v4519_v1, %v1700_v27  ;;  %v1701_v34 = vmul.f32 %v4517_v63, %v1229_v31  ;;  %v1231_v35 = vpop.f32.mrb[27].mxu0  ;;  %v1897_v36 = vadd.f32 %v4519_v1, %v1764_v29  ;;  %v1765_v37 = vmul.f32 %v4517_v63, %v1485_v32  ;;  %v1487_v38 = vpop.f32.mrb[27].mxu1 }
 0x1ce   : > { %3585 = vst [vmem:[%s4540_s23 + $0x128] sm:$0xff] %v3421_v26  }
 0x1cf   : > { %v1834_v39 = vadd.f32 %v4519_v1, %v1701_v34  ;;  %v2023_v40 = vmax.f32 %v1897_v36, 0.0  ;;  %v1898_v41 = vadd.f32 %v4519_v1, %v1765_v37  ;;  %v1959_v42 = vmax.f32 %v1833_v33, 0.0 }
 0x1d1   : > { %v1960_v43 = vmax.f32 %v1834_v39, 0.0  ;;  %v2024_v44 = vmax.f32 %v1898_v41, 0.0 }
 0x1d2   : > { %v1234_v45 = vpop.f32.mrb[28].mxu0  ;;  %v1490_v46 = vpop.f32.mrb[28].mxu1 }
 0x1d3   : > { %v3266_v47 = vpack.c.bf16 %v1960_v43, %v1959_v42  ;;  %v3426_v48 = vpack.c.bf16 %v2024_v44, %v2023_v40  ;;  %v1702_v49 = vmul.f32 %v4517_v63, %v1234_v45  ;;  %v1236_v50 = vpop.f32.mrb[29].mxu0  ;;  %v1766_v51 = vmul.f32 %v4517_v63, %v1490_v46  ;;  %v1492_v52 = vpop.f32.mrb[29].mxu1 }
 0x1d4   : > { %v1237_v53 = vpop.f32.mrb[30].mxu0  ;;  %v1493_v54 = vpop.f32.mrb[30].mxu1 }
 0x1d5   : > { %3554 = vst [vmem:[%s4540_s23 + $0x30] sm:$0xff] %v3266_v47   ;;  %3586 = vst [vmem:[%s4540_s23 + $0x130] sm:$0xff] %v3426_v48   ;;  %v1835_v55 = vadd.f32 %v4519_v1, %v1702_v49  ;;  %v1703_v56 = vmul.f32 %v4517_v63, %v1237_v53  ;;  %v1239_v57 = vpop.f32.mrb[31].mxu0  ;;  %v1899_v58 = vadd.f32 %v4519_v1, %v1766_v51  ;;  %v1495_v60 = vpop.f32.mrb[31].mxu1 }
 0x1d6   : > { %v1767_v59 = vmul.f32 %v4517_v63, %v1493_v54 }
 0x1d7   : > { %v1836_v61 = vadd.f32 %v4519_v1, %v1703_v56  ;;  %v2025_v62 = vmax.f32 %v1899_v58, 0.0  ;;  %v1961_v2 = vmax.f32 %v1835_v55, 0.0 }
 0x1d8   : > { %v1900_v0 = vadd.f32 %v4519_v1, %v1767_v59 }
 0x1d9   : > { %v1962_v3 = vmax.f32 %v1836_v61, 0.0 }
 0x1da   : > { %v2026_v4 = vmax.f32 %v1900_v0, 0.0  ;;  %v1242_v5 = vpop.f32.mrb[32].mxu0  ;;  %v1498_v6 = vpop.f32.mrb[32].mxu1 }
 0x1db   : > { %v3271_v7 = vpack.c.bf16 %v1962_v3, %v1961_v2  ;;  %v1704_v9 = vmul.f32 %v4517_v63, %v1242_v5  ;;  %v1244_v10 = vpop.f32.mrb[33].mxu0  ;;  %v1768_v11 = vmul.f32 %v4517_v63, %v1498_v6  ;;  %v1500_v12 = vpop.f32.mrb[33].mxu1 }
 0x1dc   : > { %v3431_v8 = vpack.c.bf16 %v2026_v4, %v2025_v62  ;;  %v1245_v13 = vpop.f32.mrb[34].mxu0  ;;  %v1501_v14 = vpop.f32.mrb[34].mxu1 }
 0x1dd   : > { %3555 = vst [vmem:[%s4540_s23 + $0x38] sm:$0xff] %v3271_v7   ;;  %v1837_v15 = vadd.f32 %v4519_v1, %v1704_v9  ;;  %v1705_v16 = vmul.f32 %v4517_v63, %v1245_v13  ;;  %v1247_v17 = vpop.f32.mrb[35].mxu0  ;;  %v1901_v18 = vadd.f32 %v4519_v1, %v1768_v11  ;;  %v1769_v19 = vmul.f32 %v4517_v63, %v1501_v14  ;;  %v1503_v20 = vpop.f32.mrb[35].mxu1 }
 0x1de   : > { %3587 = vst [vmem:[%s4540_s23 + $0x138] sm:$0xff] %v3431_v8  }
 0x1df   : > { %v1838_v21 = vadd.f32 %v4519_v1, %v1705_v16  ;;  %v2027_v22 = vmax.f32 %v1901_v18, 0.0  ;;  %v1902_v23 = vadd.f32 %v4519_v1, %v1769_v19  ;;  %v1963_v24 = vmax.f32 %v1837_v15, 0.0 }
 0x1e1   : > { %v1964_v25 = vmax.f32 %v1838_v21, 0.0  ;;  %v2028_v26 = vmax.f32 %v1902_v23, 0.0 }
 0x1e2   : > { %v1250_v27 = vpop.f32.mrb[36].mxu0  ;;  %v1506_v28 = vpop.f32.mrb[36].mxu1 }
 0x1e3   : > { %v3276_v29 = vpack.c.bf16 %v1964_v25, %v1963_v24  ;;  %v3436_v30 = vpack.c.bf16 %v2028_v26, %v2027_v22  ;;  %v1706_v31 = vmul.f32 %v4517_v63, %v1250_v27  ;;  %v1252_v32 = vpop.f32.mrb[37].mxu0  ;;  %v1770_v33 = vmul.f32 %v4517_v63, %v1506_v28  ;;  %v1508_v34 = vpop.f32.mrb[37].mxu1 }
 0x1e4   : > { %v1253_v35 = vpop.f32.mrb[38].mxu0  ;;  %v1509_v36 = vpop.f32.mrb[38].mxu1 }
 0x1e5   : > { %3556 = vst [vmem:[%s4540_s23 + $0x40] sm:$0xff] %v3276_v29   ;;  %3588 = vst [vmem:[%s4540_s23 + $0x140] sm:$0xff] %v3436_v30   ;;  %v1839_v37 = vadd.f32 %v4519_v1, %v1706_v31  ;;  %v1707_v38 = vmul.f32 %v4517_v63, %v1253_v35  ;;  %v1255_v39 = vpop.f32.mrb[39].mxu0  ;;  %v1903_v40 = vadd.f32 %v4519_v1, %v1770_v33  ;;  %v1511_v42 = vpop.f32.mrb[39].mxu1 }
 0x1e6   : > { %v1771_v41 = vmul.f32 %v4517_v63, %v1509_v36 }
 0x1e7   : > { %v1840_v43 = vadd.f32 %v4519_v1, %v1707_v38  ;;  %v2029_v44 = vmax.f32 %v1903_v40, 0.0  ;;  %v1965_v46 = vmax.f32 %v1839_v37, 0.0 }
 0x1e8   : > { %v1904_v45 = vadd.f32 %v4519_v1, %v1771_v41 }
 0x1e9   : > { %v1966_v47 = vmax.f32 %v1840_v43, 0.0 }
 0x1ea   : > { %v2030_v48 = vmax.f32 %v1904_v45, 0.0  ;;  %v1258_v49 = vpop.f32.mrb[40].mxu0  ;;  %v1514_v50 = vpop.f32.mrb[40].mxu1 }
 0x1eb   : > { %v3281_v51 = vpack.c.bf16 %v1966_v47, %v1965_v46  ;;  %v1708_v53 = vmul.f32 %v4517_v63, %v1258_v49  ;;  %v1260_v54 = vpop.f32.mrb[41].mxu0  ;;  %v1772_v55 = vmul.f32 %v4517_v63, %v1514_v50  ;;  %v1516_v56 = vpop.f32.mrb[41].mxu1 }
 0x1ec   : > { %v3441_v52 = vpack.c.bf16 %v2030_v48, %v2029_v44  ;;  %v1261_v57 = vpop.f32.mrb[42].mxu0  ;;  %v1517_v58 = vpop.f32.mrb[42].mxu1 }
 0x1ed   : > { %3557 = vst [vmem:[%s4540_s23 + $0x48] sm:$0xff] %v3281_v51   ;;  %v1841_v59 = vadd.f32 %v4519_v1, %v1708_v53  ;;  %v1709_v60 = vmul.f32 %v4517_v63, %v1261_v57  ;;  %v1263_v61 = vpop.f32.mrb[43].mxu0  ;;  %v1905_v62 = vadd.f32 %v4519_v1, %v1772_v55  ;;  %v1773_v0 = vmul.f32 %v4517_v63, %v1517_v58  ;;  %v1519_v2 = vpop.f32.mrb[43].mxu1 }
 0x1ee   : > { %3589 = vst [vmem:[%s4540_s23 + $0x148] sm:$0xff] %v3441_v52  }
 0x1ef   : > { %v1842_v3 = vadd.f32 %v4519_v1, %v1709_v60  ;;  %v2031_v4 = vmax.f32 %v1905_v62, 0.0  ;;  %v1906_v5 = vadd.f32 %v4519_v1, %v1773_v0  ;;  %v1967_v6 = vmax.f32 %v1841_v59, 0.0 }
 0x1f1   : > { %v1968_v7 = vmax.f32 %v1842_v3, 0.0  ;;  %v2032_v8 = vmax.f32 %v1906_v5, 0.0 }
 0x1f2   : > { %v1266_v9 = vpop.f32.mrb[44].mxu0  ;;  %v1522_v10 = vpop.f32.mrb[44].mxu1 }
 0x1f3   : > { %v3286_v11 = vpack.c.bf16 %v1968_v7, %v1967_v6  ;;  %v3446_v12 = vpack.c.bf16 %v2032_v8, %v2031_v4  ;;  %v1710_v13 = vmul.f32 %v4517_v63, %v1266_v9  ;;  %v1268_v14 = vpop.f32.mrb[45].mxu0  ;;  %v1774_v15 = vmul.f32 %v4517_v63, %v1522_v10  ;;  %v1524_v16 = vpop.f32.mrb[45].mxu1 }
 0x1f4   : > { %v1269_v17 = vpop.f32.mrb[46].mxu0  ;;  %v1525_v18 = vpop.f32.mrb[46].mxu1 }
 0x1f5   : > { %3558 = vst [vmem:[%s4540_s23 + $0x50] sm:$0xff] %v3286_v11   ;;  %3590 = vst [vmem:[%s4540_s23 + $0x150] sm:$0xff] %v3446_v12   ;;  %v1843_v19 = vadd.f32 %v4519_v1, %v1710_v13  ;;  %v1711_v20 = vmul.f32 %v4517_v63, %v1269_v17  ;;  %v1271_v21 = vpop.f32.mrb[47].mxu0  ;;  %v1907_v22 = vadd.f32 %v4519_v1, %v1774_v15  ;;  %v1527_v24 = vpop.f32.mrb[47].mxu1 }
 0x1f6   : > { %v1775_v23 = vmul.f32 %v4517_v63, %v1525_v18 }
 0x1f7   : > { %v1844_v25 = vadd.f32 %v4519_v1, %v1711_v20  ;;  %v2033_v26 = vmax.f32 %v1907_v22, 0.0  ;;  %v1969_v28 = vmax.f32 %v1843_v19, 0.0 }
 0x1f8   : > { %v1908_v27 = vadd.f32 %v4519_v1, %v1775_v23 }
 0x1f9   : > { %v1970_v29 = vmax.f32 %v1844_v25, 0.0 }
 0x1fa   : > { %v2034_v30 = vmax.f32 %v1908_v27, 0.0  ;;  %v1274_v31 = vpop.f32.mrb[48].mxu0  ;;  %v1530_v32 = vpop.f32.mrb[48].mxu1 }
 0x1fb   : > { %v3291_v33 = vpack.c.bf16 %v1970_v29, %v1969_v28  ;;  %v1712_v35 = vmul.f32 %v4517_v63, %v1274_v31  ;;  %v1276_v36 = vpop.f32.mrb[49].mxu0  ;;  %v1776_v37 = vmul.f32 %v4517_v63, %v1530_v32  ;;  %v1532_v38 = vpop.f32.mrb[49].mxu1 }
 0x1fc   : > { %v3451_v34 = vpack.c.bf16 %v2034_v30, %v2033_v26  ;;  %v1277_v39 = vpop.f32.mrb[50].mxu0  ;;  %v1533_v40 = vpop.f32.mrb[50].mxu1 }
 0x1fd   : > { %3559 = vst [vmem:[%s4540_s23 + $0x58] sm:$0xff] %v3291_v33   ;;  %v1845_v41 = vadd.f32 %v4519_v1, %v1712_v35  ;;  %v1713_v42 = vmul.f32 %v4517_v63, %v1277_v39  ;;  %v1279_v43 = vpop.f32.mrb[51].mxu0  ;;  %v1909_v44 = vadd.f32 %v4519_v1, %v1776_v37  ;;  %v1777_v45 = vmul.f32 %v4517_v63, %v1533_v40  ;;  %v1535_v46 = vpop.f32.mrb[51].mxu1 }
 0x1fe   : > { %3591 = vst [vmem:[%s4540_s23 + $0x158] sm:$0xff] %v3451_v34  }
 0x1ff   : > { %v1846_v47 = vadd.f32 %v4519_v1, %v1713_v42  ;;  %v2035_v48 = vmax.f32 %v1909_v44, 0.0  ;;  %v1910_v49 = vadd.f32 %v4519_v1, %v1777_v45  ;;  %v1971_v50 = vmax.f32 %v1845_v41, 0.0 }
 0x201   : > { %v1972_v51 = vmax.f32 %v1846_v47, 0.0  ;;  %v2036_v52 = vmax.f32 %v1910_v49, 0.0 }
 0x202   : > { %v1282_v53 = vpop.f32.mrb[52].mxu0  ;;  %v1538_v54 = vpop.f32.mrb[52].mxu1 }
 0x203   : > { %v3296_v55 = vpack.c.bf16 %v1972_v51, %v1971_v50  ;;  %v3456_v56 = vpack.c.bf16 %v2036_v52, %v2035_v48  ;;  %v1714_v57 = vmul.f32 %v4517_v63, %v1282_v53  ;;  %v1284_v58 = vpop.f32.mrb[53].mxu0  ;;  %v1778_v59 = vmul.f32 %v4517_v63, %v1538_v54  ;;  %v1540_v60 = vpop.f32.mrb[53].mxu1 }
 0x204   : > { %v1285_v61 = vpop.f32.mrb[54].mxu0  ;;  %v1541_v62 = vpop.f32.mrb[54].mxu1 }
 0x205   : > { %3560 = vst [vmem:[%s4540_s23 + $0x60] sm:$0xff] %v3296_v55   ;;  %3592 = vst [vmem:[%s4540_s23 + $0x160] sm:$0xff] %v3456_v56   ;;  %v1847_v0 = vadd.f32 %v4519_v1, %v1714_v57  ;;  %v1715_v2 = vmul.f32 %v4517_v63, %v1285_v61  ;;  %v1287_v3 = vpop.f32.mrb[55].mxu0  ;;  %v1911_v4 = vadd.f32 %v4519_v1, %v1778_v59  ;;  %v1543_v6 = vpop.f32.mrb[55].mxu1 }
 0x206   : > { %v1779_v5 = vmul.f32 %v4517_v63, %v1541_v62 }
 0x207   : > { %v1848_v7 = vadd.f32 %v4519_v1, %v1715_v2  ;;  %v2037_v8 = vmax.f32 %v1911_v4, 0.0  ;;  %v1973_v10 = vmax.f32 %v1847_v0, 0.0 }
 0x208   : > { %v1912_v9 = vadd.f32 %v4519_v1, %v1779_v5 }
 0x209   : > { %v1974_v11 = vmax.f32 %v1848_v7, 0.0 }
 0x20a   : > { %v2038_v12 = vmax.f32 %v1912_v9, 0.0  ;;  %v1290_v13 = vpop.f32.mrb[56].mxu0  ;;  %v1546_v14 = vpop.f32.mrb[56].mxu1 }
 0x20b   : > { %v3301_v15 = vpack.c.bf16 %v1974_v11, %v1973_v10  ;;  %v1716_v17 = vmul.f32 %v4517_v63, %v1290_v13  ;;  %v1292_v18 = vpop.f32.mrb[57].mxu0  ;;  %v1780_v19 = vmul.f32 %v4517_v63, %v1546_v14  ;;  %v1548_v20 = vpop.f32.mrb[57].mxu1 }
 0x20c   : > { %v3461_v16 = vpack.c.bf16 %v2038_v12, %v2037_v8  ;;  %v1293_v21 = vpop.f32.mrb[58].mxu0  ;;  %v1549_v22 = vpop.f32.mrb[58].mxu1 }
 0x20d   : > { %3561 = vst [vmem:[%s4540_s23 + $0x68] sm:$0xff] %v3301_v15   ;;  %v1849_v23 = vadd.f32 %v4519_v1, %v1716_v17  ;;  %v1717_v24 = vmul.f32 %v4517_v63, %v1293_v21  ;;  %v1295_v25 = vpop.f32.mrb[59].mxu0  ;;  %v1913_v26 = vadd.f32 %v4519_v1, %v1780_v19  ;;  %v1781_v27 = vmul.f32 %v4517_v63, %v1549_v22  ;;  %v1551_v28 = vpop.f32.mrb[59].mxu1 }
 0x20e   : > { %3593 = vst [vmem:[%s4540_s23 + $0x168] sm:$0xff] %v3461_v16  }
 0x20f   : > { %v1850_v29 = vadd.f32 %v4519_v1, %v1717_v24  ;;  %v2039_v30 = vmax.f32 %v1913_v26, 0.0  ;;  %v1914_v31 = vadd.f32 %v4519_v1, %v1781_v27  ;;  %v1975_v32 = vmax.f32 %v1849_v23, 0.0 }
 0x211   : > { %v1976_v33 = vmax.f32 %v1850_v29, 0.0  ;;  %v2040_v34 = vmax.f32 %v1914_v31, 0.0 }
 0x212   : > { %v1298_v35 = vpop.f32.mrb[60].mxu0  ;;  %v1554_v36 = vpop.f32.mrb[60].mxu1 }
 0x213   : > { %v3306_v37 = vpack.c.bf16 %v1976_v33, %v1975_v32  ;;  %v3466_v38 = vpack.c.bf16 %v2040_v34, %v2039_v30  ;;  %v1718_v39 = vmul.f32 %v4517_v63, %v1298_v35  ;;  %v1300_v40 = vpop.f32.mrb[61].mxu0  ;;  %v1782_v41 = vmul.f32 %v4517_v63, %v1554_v36  ;;  %v1556_v42 = vpop.f32.mrb[61].mxu1 }
 0x214   : > { %v1301_v43 = vpop.f32.mrb[62].mxu0  ;;  %v1557_v44 = vpop.f32.mrb[62].mxu1 }
 0x215   : > { %3562 = vst [vmem:[%s4540_s23 + $0x70] sm:$0xff] %v3306_v37   ;;  %3594 = vst [vmem:[%s4540_s23 + $0x170] sm:$0xff] %v3466_v38   ;;  %v1851_v45 = vadd.f32 %v4519_v1, %v1718_v39  ;;  %v1719_v46 = vmul.f32 %v4517_v63, %v1301_v43  ;;  %v1303_v47 = vpop.f32.mrb[63].mxu0  ;;  %v1915_v48 = vadd.f32 %v4519_v1, %v1782_v41  ;;  %v1559_v50 = vpop.f32.mrb[63].mxu1 }
 0x216   : > { %v1783_v49 = vmul.f32 %v4517_v63, %v1557_v44 }
 0x217   : > { %v1852_v51 = vadd.f32 %v4519_v1, %v1719_v46  ;;  %v2041_v52 = vmax.f32 %v1915_v48, 0.0  ;;  %v1977_v54 = vmax.f32 %v1851_v45, 0.0 }
 0x218   : > { %v1916_v53 = vadd.f32 %v4519_v1, %v1783_v49 }
 0x219   : > { %v1978_v55 = vmax.f32 %v1852_v51, 0.0 }
 0x21a   : > { %v2042_v56 = vmax.f32 %v1916_v53, 0.0  ;;  %v1306_v57 = vpop.f32.mrb[64].mxu0  ;;  %v1562_v58 = vpop.f32.mrb[64].mxu1 }
 0x21b   : > { %v3311_v59 = vpack.c.bf16 %v1978_v55, %v1977_v54  ;;  %v1720_v61 = vmul.f32 %v4517_v63, %v1306_v57  ;;  %v1308_v62 = vpop.f32.mrb[65].mxu0  ;;  %v1784_v0 = vmul.f32 %v4517_v63, %v1562_v58  ;;  %v1564_v2 = vpop.f32.mrb[65].mxu1 }
 0x21c   : > { %v3471_v60 = vpack.c.bf16 %v2042_v56, %v2041_v52  ;;  %v1309_v3 = vpop.f32.mrb[66].mxu0  ;;  %v1565_v4 = vpop.f32.mrb[66].mxu1 }
 0x21d   : > { %3563 = vst [vmem:[%s4540_s23 + $0x78] sm:$0xff] %v3311_v59   ;;  %v1853_v5 = vadd.f32 %v4519_v1, %v1720_v61  ;;  %v1721_v6 = vmul.f32 %v4517_v63, %v1309_v3  ;;  %v1311_v7 = vpop.f32.mrb[67].mxu0  ;;  %v1917_v8 = vadd.f32 %v4519_v1, %v1784_v0  ;;  %v1785_v9 = vmul.f32 %v4517_v63, %v1565_v4  ;;  %v1567_v10 = vpop.f32.mrb[67].mxu1 }
 0x21e   : > { %3595 = vst [vmem:[%s4540_s23 + $0x178] sm:$0xff] %v3471_v60  }
 0x21f   : > { %v1854_v11 = vadd.f32 %v4519_v1, %v1721_v6  ;;  %v2043_v12 = vmax.f32 %v1917_v8, 0.0  ;;  %v1918_v13 = vadd.f32 %v4519_v1, %v1785_v9  ;;  %v1979_v14 = vmax.f32 %v1853_v5, 0.0 }
 0x221   : > { %v1980_v15 = vmax.f32 %v1854_v11, 0.0  ;;  %v2044_v16 = vmax.f32 %v1918_v13, 0.0 }
 0x222   : > { %v1314_v17 = vpop.f32.mrb[68].mxu0  ;;  %v1570_v18 = vpop.f32.mrb[68].mxu1 }
 0x223   : > { %v3316_v19 = vpack.c.bf16 %v1980_v15, %v1979_v14  ;;  %v3476_v20 = vpack.c.bf16 %v2044_v16, %v2043_v12  ;;  %v1722_v21 = vmul.f32 %v4517_v63, %v1314_v17  ;;  %v1316_v22 = vpop.f32.mrb[69].mxu0  ;;  %v1786_v23 = vmul.f32 %v4517_v63, %v1570_v18  ;;  %v1572_v24 = vpop.f32.mrb[69].mxu1 }
 0x224   : > { %v1317_v25 = vpop.f32.mrb[70].mxu0  ;;  %v1573_v26 = vpop.f32.mrb[70].mxu1 }
 0x225   : > { %3564 = vst [vmem:[%s4540_s23 + $0x80] sm:$0xff] %v3316_v19   ;;  %3596 = vst [vmem:[%s4540_s23 + $0x180] sm:$0xff] %v3476_v20   ;;  %v1855_v27 = vadd.f32 %v4519_v1, %v1722_v21  ;;  %v1723_v28 = vmul.f32 %v4517_v63, %v1317_v25  ;;  %v1319_v29 = vpop.f32.mrb[71].mxu0  ;;  %v1919_v30 = vadd.f32 %v4519_v1, %v1786_v23  ;;  %v1575_v32 = vpop.f32.mrb[71].mxu1  ;;  %v4738_v25 = vld [vmem:[#allocation7] ss:$0 sm:$0xff] }
 0x226   : > { %v1787_v31 = vmul.f32 %v4517_v63, %v1573_v26 }
 0x227   : > { %v1856_v33 = vadd.f32 %v4519_v1, %v1723_v28  ;;  %v2045_v34 = vmax.f32 %v1919_v30, 0.0  ;;  %v1981_v36 = vmax.f32 %v1855_v27, 0.0 }
 0x228   : > { %v1920_v35 = vadd.f32 %v4519_v1, %v1787_v31 }
 0x229   : > { %v1982_v37 = vmax.f32 %v1856_v33, 0.0 }
 0x22a   : > { %v2046_v38 = vmax.f32 %v1920_v35, 0.0  ;;  %v1322_v39 = vpop.f32.mrb[72].mxu0  ;;  %v1578_v40 = vpop.f32.mrb[72].mxu1 }
 0x22b   : > { %v3321_v41 = vpack.c.bf16 %v1982_v37, %v1981_v36  ;;  %v1724_v43 = vmul.f32 %v4517_v63, %v1322_v39  ;;  %v1324_v44 = vpop.f32.mrb[73].mxu0  ;;  %v1788_v45 = vmul.f32 %v4517_v63, %v1578_v40  ;;  %v1580_v46 = vpop.f32.mrb[73].mxu1 }
 0x22c   : > { %v3481_v42 = vpack.c.bf16 %v2046_v38, %v2045_v34  ;;  %v1325_v47 = vpop.f32.mrb[74].mxu0  ;;  %v1581_v48 = vpop.f32.mrb[74].mxu1 }
 0x22d   : > { %3565 = vst [vmem:[%s4540_s23 + $0x88] sm:$0xff] %v3321_v41   ;;  %v1857_v49 = vadd.f32 %v4519_v1, %v1724_v43  ;;  %v1725_v50 = vmul.f32 %v4517_v63, %v1325_v47  ;;  %v1327_v51 = vpop.f32.mrb[75].mxu0  ;;  %v1921_v52 = vadd.f32 %v4519_v1, %v1788_v45  ;;  %v1789_v53 = vmul.f32 %v4517_v63, %v1581_v48  ;;  %v1583_v54 = vpop.f32.mrb[75].mxu1 }
 0x22e   : > { %3597 = vst [vmem:[%s4540_s23 + $0x188] sm:$0xff] %v3481_v42  }
 0x22f   : > { %v1858_v55 = vadd.f32 %v4519_v1, %v1725_v50  ;;  %v2047_v56 = vmax.f32 %v1921_v52, 0.0  ;;  %v1922_v57 = vadd.f32 %v4519_v1, %v1789_v53  ;;  %v1983_v58 = vmax.f32 %v1857_v49, 0.0 }
 0x231   : > { %v1984_v59 = vmax.f32 %v1858_v55, 0.0  ;;  %v2048_v60 = vmax.f32 %v1922_v57, 0.0 }
 0x232   : > { %v1330_v61 = vpop.f32.mrb[76].mxu0  ;;  %v1586_v62 = vpop.f32.mrb[76].mxu1 }
 0x233   : > { %v3326_v0 = vpack.c.bf16 %v1984_v59, %v1983_v58  ;;  %v3486_v2 = vpack.c.bf16 %v2048_v60, %v2047_v56  ;;  %v1726_v3 = vmul.f32 %v4517_v63, %v1330_v61  ;;  %v1332_v4 = vpop.f32.mrb[77].mxu0  ;;  %v1790_v5 = vmul.f32 %v4517_v63, %v1586_v62  ;;  %v1588_v6 = vpop.f32.mrb[77].mxu1 }
 0x234   : > { %v1333_v7 = vpop.f32.mrb[78].mxu0  ;;  %v1589_v8 = vpop.f32.mrb[78].mxu1 }
 0x235   : > { %3566 = vst [vmem:[%s4540_s23 + $0x90] sm:$0xff] %v3326_v0   ;;  %3598 = vst [vmem:[%s4540_s23 + $0x190] sm:$0xff] %v3486_v2   ;;  %v1859_v9 = vadd.f32 %v4519_v1, %v1726_v3  ;;  %v1727_v10 = vmul.f32 %v4517_v63, %v1333_v7  ;;  %v1335_v11 = vpop.f32.mrb[79].mxu0  ;;  %v1923_v12 = vadd.f32 %v4519_v1, %v1790_v5  ;;  %v1591_v14 = vpop.f32.mrb[79].mxu1 }
 0x236   : > { %v1791_v13 = vmul.f32 %v4517_v63, %v1589_v8 }
 0x237   : > { %v1860_v15 = vadd.f32 %v4519_v1, %v1727_v10  ;;  %v2049_v16 = vmax.f32 %v1923_v12, 0.0  ;;  %v1985_v18 = vmax.f32 %v1859_v9, 0.0 }
 0x238   : > { %v1924_v17 = vadd.f32 %v4519_v1, %v1791_v13  ;;  %v4744_v1 = vld [vmem:[#allocation8] ss:$0 sm:$0xff] }
 0x239   : > { %v1986_v19 = vmax.f32 %v1860_v15, 0.0 }
 0x23a   : > { %v2050_v20 = vmax.f32 %v1924_v17, 0.0  ;;  %v1338_v21 = vpop.f32.mrb[80].mxu0  ;;  %v1594_v22 = vpop.f32.mrb[80].mxu1 }
 0x23b   : > { %v3331_v23 = vpack.c.bf16 %v1986_v19, %v1985_v18  ;;  %v1728_v26 = vmul.f32 %v4738_v25, %v1338_v21  ;;  %v1340_v63 = vpop.f32.mrb[81].mxu0  ;;  %v1792_v27 = vmul.f32 %v4738_v25, %v1594_v22  ;;  %v1596_v28 = vpop.f32.mrb[81].mxu1 }
 0x23c   : > { %v3491_v24 = vpack.c.bf16 %v2050_v20, %v2049_v16  ;;  %v1341_v29 = vpop.f32.mrb[82].mxu0  ;;  %v1597_v30 = vpop.f32.mrb[82].mxu1 }
 0x23d   : > { %3567 = vst [vmem:[%s4540_s23 + $0x98] sm:$0xff] %v3331_v23   ;;  %v1861_v31 = vadd.f32 %v4744_v1, %v1728_v26  ;;  %v1729_v32 = vmul.f32 %v4738_v25, %v1341_v29  ;;  %v1343_v33 = vpop.f32.mrb[83].mxu0  ;;  %v1925_v34 = vadd.f32 %v4744_v1, %v1792_v27  ;;  %v1793_v35 = vmul.f32 %v4738_v25, %v1597_v30  ;;  %v1599_v36 = vpop.f32.mrb[83].mxu1 }
 0x23e   : > { %3599 = vst [vmem:[%s4540_s23 + $0x198] sm:$0xff] %v3491_v24  }
 0x23f   : > { %v1862_v37 = vadd.f32 %v4744_v1, %v1729_v32  ;;  %v2051_v38 = vmax.f32 %v1925_v34, 0.0  ;;  %v1926_v39 = vadd.f32 %v4744_v1, %v1793_v35  ;;  %v1987_v40 = vmax.f32 %v1861_v31, 0.0 }
 0x241   : > { %v1988_v41 = vmax.f32 %v1862_v37, 0.0  ;;  %v2052_v42 = vmax.f32 %v1926_v39, 0.0 }
 0x242   : > { %v1346_v43 = vpop.f32.mrb[84].mxu0  ;;  %v1602_v44 = vpop.f32.mrb[84].mxu1 }
 0x243   : > { %v3336_v45 = vpack.c.bf16 %v1988_v41, %v1987_v40  ;;  %v3496_v46 = vpack.c.bf16 %v2052_v42, %v2051_v38  ;;  %v1730_v47 = vmul.f32 %v4738_v25, %v1346_v43  ;;  %v1348_v48 = vpop.f32.mrb[85].mxu0  ;;  %v1794_v49 = vmul.f32 %v4738_v25, %v1602_v44  ;;  %v1604_v50 = vpop.f32.mrb[85].mxu1 }
 0x244   : > { %v1349_v51 = vpop.f32.mrb[86].mxu0  ;;  %v1605_v52 = vpop.f32.mrb[86].mxu1 }
 0x245   : > { %3568 = vst [vmem:[%s4540_s23 + $0xa0] sm:$0xff] %v3336_v45   ;;  %3600 = vst [vmem:[%s4540_s23 + $0x1a0] sm:$0xff] %v3496_v46   ;;  %v1863_v53 = vadd.f32 %v4744_v1, %v1730_v47  ;;  %v1731_v54 = vmul.f32 %v4738_v25, %v1349_v51  ;;  %v1351_v55 = vpop.f32.mrb[87].mxu0  ;;  %v1927_v56 = vadd.f32 %v4744_v1, %v1794_v49  ;;  %v1607_v58 = vpop.f32.mrb[87].mxu1 }
 0x246   : > { %v1795_v57 = vmul.f32 %v4738_v25, %v1605_v52 }
 0x247   : > { %v1864_v59 = vadd.f32 %v4744_v1, %v1731_v54  ;;  %v2053_v60 = vmax.f32 %v1927_v56, 0.0  ;;  %v1989_v62 = vmax.f32 %v1863_v53, 0.0 }
 0x248   : > { %v1928_v61 = vadd.f32 %v4744_v1, %v1795_v57 }
 0x249   : > { %v1990_v0 = vmax.f32 %v1864_v59, 0.0 }
 0x24a   : > { %v2054_v2 = vmax.f32 %v1928_v61, 0.0  ;;  %v1354_v3 = vpop.f32.mrb[88].mxu0  ;;  %v1610_v4 = vpop.f32.mrb[88].mxu1 }
 0x24b   : > { %v3341_v5 = vpack.c.bf16 %v1990_v0, %v1989_v62  ;;  %v1732_v7 = vmul.f32 %v4738_v25, %v1354_v3  ;;  %v1356_v8 = vpop.f32.mrb[89].mxu0  ;;  %v1796_v9 = vmul.f32 %v4738_v25, %v1610_v4  ;;  %v1612_v10 = vpop.f32.mrb[89].mxu1 }
 0x24c   : > { %v3501_v6 = vpack.c.bf16 %v2054_v2, %v2053_v60  ;;  %v1357_v11 = vpop.f32.mrb[90].mxu0  ;;  %v1613_v12 = vpop.f32.mrb[90].mxu1 }
 0x24d   : > { %3569 = vst [vmem:[%s4540_s23 + $0xa8] sm:$0xff] %v3341_v5   ;;  %v1865_v13 = vadd.f32 %v4744_v1, %v1732_v7  ;;  %v1733_v14 = vmul.f32 %v4738_v25, %v1357_v11  ;;  %v1359_v15 = vpop.f32.mrb[91].mxu0  ;;  %v1929_v16 = vadd.f32 %v4744_v1, %v1796_v9  ;;  %v1797_v17 = vmul.f32 %v4738_v25, %v1613_v12  ;;  %v1615_v18 = vpop.f32.mrb[91].mxu1 }
 0x24e   : > { %3601 = vst [vmem:[%s4540_s23 + $0x1a8] sm:$0xff] %v3501_v6  }
 0x24f   : > { %v1866_v19 = vadd.f32 %v4744_v1, %v1733_v14  ;;  %v2055_v20 = vmax.f32 %v1929_v16, 0.0  ;;  %v1930_v21 = vadd.f32 %v4744_v1, %v1797_v17  ;;  %v1991_v22 = vmax.f32 %v1865_v13, 0.0 }
 0x251   : > { %v1992_v23 = vmax.f32 %v1866_v19, 0.0  ;;  %v2056_v24 = vmax.f32 %v1930_v21, 0.0 }
 0x252   : > { %v1362_v26 = vpop.f32.mrb[92].mxu0  ;;  %v1618_v63 = vpop.f32.mrb[92].mxu1 }
 0x253   : > { %v3346_v27 = vpack.c.bf16 %v1992_v23, %v1991_v22  ;;  %v3506_v28 = vpack.c.bf16 %v2056_v24, %v2055_v20  ;;  %v1734_v29 = vmul.f32 %v4738_v25, %v1362_v26  ;;  %v1364_v30 = vpop.f32.mrb[93].mxu0  ;;  %v1798_v31 = vmul.f32 %v4738_v25, %v1618_v63  ;;  %v1620_v32 = vpop.f32.mrb[93].mxu1 }
 0x254   : > { %v1365_v33 = vpop.f32.mrb[94].mxu0  ;;  %v1621_v34 = vpop.f32.mrb[94].mxu1 }
 0x255   : > { %3570 = vst [vmem:[%s4540_s23 + $0xb0] sm:$0xff] %v3346_v27   ;;  %3602 = vst [vmem:[%s4540_s23 + $0x1b0] sm:$0xff] %v3506_v28   ;;  %v1867_v35 = vadd.f32 %v4744_v1, %v1734_v29  ;;  %v1735_v36 = vmul.f32 %v4738_v25, %v1365_v33  ;;  %v1367_v37 = vpop.f32.mrb[95].mxu0  ;;  %v1931_v38 = vadd.f32 %v4744_v1, %v1798_v31  ;;  %v1623_v40 = vpop.f32.mrb[95].mxu1 }
 0x256   : > { %v1799_v39 = vmul.f32 %v4738_v25, %v1621_v34 }
 0x257   : > { %v1868_v41 = vadd.f32 %v4744_v1, %v1735_v36  ;;  %v2057_v42 = vmax.f32 %v1931_v38, 0.0  ;;  %v1993_v44 = vmax.f32 %v1867_v35, 0.0 }
 0x258   : > { %v1932_v43 = vadd.f32 %v4744_v1, %v1799_v39 }
 0x259   : > { %v1994_v45 = vmax.f32 %v1868_v41, 0.0 }
 0x25a   : > { %v2058_v46 = vmax.f32 %v1932_v43, 0.0  ;;  %v1370_v47 = vpop.f32.mrb[96].mxu0  ;;  %v1626_v48 = vpop.f32.mrb[96].mxu1 }
 0x25b   : > { %v3351_v49 = vpack.c.bf16 %v1994_v45, %v1993_v44  ;;  %v1736_v51 = vmul.f32 %v4738_v25, %v1370_v47  ;;  %v1372_v52 = vpop.f32.mrb[97].mxu0  ;;  %v1800_v53 = vmul.f32 %v4738_v25, %v1626_v48  ;;  %v1628_v54 = vpop.f32.mrb[97].mxu1 }
 0x25c   : > { %v3511_v50 = vpack.c.bf16 %v2058_v46, %v2057_v42  ;;  %v1373_v55 = vpop.f32.mrb[98].mxu0  ;;  %v1629_v56 = vpop.f32.mrb[98].mxu1 }
 0x25d   : > { %3571 = vst [vmem:[%s4540_s23 + $0xb8] sm:$0xff] %v3351_v49   ;;  %v1869_v57 = vadd.f32 %v4744_v1, %v1736_v51  ;;  %v1737_v58 = vmul.f32 %v4738_v25, %v1373_v55  ;;  %v1375_v59 = vpop.f32.mrb[99].mxu0  ;;  %v1933_v60 = vadd.f32 %v4744_v1, %v1800_v53  ;;  %v1801_v61 = vmul.f32 %v4738_v25, %v1629_v56  ;;  %v1631_v62 = vpop.f32.mrb[99].mxu1 }
 0x25e   : > { %3603 = vst [vmem:[%s4540_s23 + $0x1b8] sm:$0xff] %v3511_v50  }
 0x25f   : > { %v1870_v0 = vadd.f32 %v4744_v1, %v1737_v58  ;;  %v2059_v2 = vmax.f32 %v1933_v60, 0.0  ;;  %v1934_v3 = vadd.f32 %v4744_v1, %v1801_v61  ;;  %v1995_v4 = vmax.f32 %v1869_v57, 0.0 }
 0x261   : > { %v1996_v5 = vmax.f32 %v1870_v0, 0.0  ;;  %v2060_v6 = vmax.f32 %v1934_v3, 0.0 }
 0x262   : > { %v1378_v7 = vpop.f32.mrb[100].mxu0  ;;  %v1634_v8 = vpop.f32.mrb[100].mxu1 }
 0x263   : > { %v3356_v9 = vpack.c.bf16 %v1996_v5, %v1995_v4  ;;  %v3516_v10 = vpack.c.bf16 %v2060_v6, %v2059_v2  ;;  %v1738_v11 = vmul.f32 %v4738_v25, %v1378_v7  ;;  %v1380_v12 = vpop.f32.mrb[101].mxu0  ;;  %v1802_v13 = vmul.f32 %v4738_v25, %v1634_v8  ;;  %v1636_v14 = vpop.f32.mrb[101].mxu1 }
 0x264   : > { %v1381_v15 = vpop.f32.mrb[102].mxu0  ;;  %v1637_v16 = vpop.f32.mrb[102].mxu1 }
 0x265   : > { %3572 = vst [vmem:[%s4540_s23 + $0xc0] sm:$0xff] %v3356_v9   ;;  %3604 = vst [vmem:[%s4540_s23 + $0x1c0] sm:$0xff] %v3516_v10   ;;  %v1871_v17 = vadd.f32 %v4744_v1, %v1738_v11  ;;  %v1739_v18 = vmul.f32 %v4738_v25, %v1381_v15  ;;  %v1383_v19 = vpop.f32.mrb[103].mxu0  ;;  %v1935_v20 = vadd.f32 %v4744_v1, %v1802_v13  ;;  %v1639_v22 = vpop.f32.mrb[103].mxu1 }
 0x266   : > { %v1803_v21 = vmul.f32 %v4738_v25, %v1637_v16 }
 0x267   : > { %v1872_v23 = vadd.f32 %v4744_v1, %v1739_v18  ;;  %v2061_v24 = vmax.f32 %v1935_v20, 0.0  ;;  %v1997_v63 = vmax.f32 %v1871_v17, 0.0 }
 0x268   : > { %v1936_v26 = vadd.f32 %v4744_v1, %v1803_v21 }
 0x269   : > { %v1998_v27 = vmax.f32 %v1872_v23, 0.0 }
 0x26a   : > { %v2062_v28 = vmax.f32 %v1936_v26, 0.0  ;;  %v1386_v29 = vpop.f32.mrb[104].mxu0  ;;  %v1642_v30 = vpop.f32.mrb[104].mxu1 }
 0x26b   : > { %v3361_v31 = vpack.c.bf16 %v1998_v27, %v1997_v63  ;;  %v1740_v33 = vmul.f32 %v4738_v25, %v1386_v29  ;;  %v1388_v34 = vpop.f32.mrb[105].mxu0  ;;  %v1804_v35 = vmul.f32 %v4738_v25, %v1642_v30  ;;  %v1644_v36 = vpop.f32.mrb[105].mxu1 }
 0x26c   : > { %v3521_v32 = vpack.c.bf16 %v2062_v28, %v2061_v24  ;;  %v1389_v37 = vpop.f32.mrb[106].mxu0  ;;  %v1645_v38 = vpop.f32.mrb[106].mxu1 }
 0x26d   : > { %3573 = vst [vmem:[%s4540_s23 + $0xc8] sm:$0xff] %v3361_v31   ;;  %v1873_v39 = vadd.f32 %v4744_v1, %v1740_v33  ;;  %v1741_v40 = vmul.f32 %v4738_v25, %v1389_v37  ;;  %v1391_v41 = vpop.f32.mrb[107].mxu0  ;;  %v1937_v42 = vadd.f32 %v4744_v1, %v1804_v35  ;;  %v1805_v43 = vmul.f32 %v4738_v25, %v1645_v38  ;;  %v1647_v44 = vpop.f32.mrb[107].mxu1 }
 0x26e   : > { %3605 = vst [vmem:[%s4540_s23 + $0x1c8] sm:$0xff] %v3521_v32  }
 0x26f   : > { %v1874_v45 = vadd.f32 %v4744_v1, %v1741_v40  ;;  %v2063_v46 = vmax.f32 %v1937_v42, 0.0  ;;  %v1938_v47 = vadd.f32 %v4744_v1, %v1805_v43  ;;  %v1999_v48 = vmax.f32 %v1873_v39, 0.0 }
 0x271   : > { %v2000_v49 = vmax.f32 %v1874_v45, 0.0  ;;  %v2064_v50 = vmax.f32 %v1938_v47, 0.0 }
 0x272   : > { %v1394_v51 = vpop.f32.mrb[108].mxu0  ;;  %v1650_v52 = vpop.f32.mrb[108].mxu1 }
 0x273   : > { %v3366_v53 = vpack.c.bf16 %v2000_v49, %v1999_v48  ;;  %v3526_v54 = vpack.c.bf16 %v2064_v50, %v2063_v46  ;;  %v1742_v55 = vmul.f32 %v4738_v25, %v1394_v51  ;;  %v1396_v56 = vpop.f32.mrb[109].mxu0  ;;  %v1806_v57 = vmul.f32 %v4738_v25, %v1650_v52  ;;  %v1652_v58 = vpop.f32.mrb[109].mxu1 }
 0x274   : > { %v1397_v59 = vpop.f32.mrb[110].mxu0  ;;  %v1653_v60 = vpop.f32.mrb[110].mxu1 }
 0x275   : > { %3574 = vst [vmem:[%s4540_s23 + $0xd0] sm:$0xff] %v3366_v53   ;;  %3606 = vst [vmem:[%s4540_s23 + $0x1d0] sm:$0xff] %v3526_v54   ;;  %v1875_v61 = vadd.f32 %v4744_v1, %v1742_v55  ;;  %v1743_v62 = vmul.f32 %v4738_v25, %v1397_v59  ;;  %v1399_v0 = vpop.f32.mrb[111].mxu0  ;;  %v1939_v2 = vadd.f32 %v4744_v1, %v1806_v57  ;;  %v1655_v4 = vpop.f32.mrb[111].mxu1 }
 0x276   : > { %v1807_v3 = vmul.f32 %v4738_v25, %v1653_v60 }
 0x277   : > { %v1876_v5 = vadd.f32 %v4744_v1, %v1743_v62  ;;  %v2065_v6 = vmax.f32 %v1939_v2, 0.0  ;;  %v2001_v8 = vmax.f32 %v1875_v61, 0.0 }
 0x278   : > { %v1940_v7 = vadd.f32 %v4744_v1, %v1807_v3 }
 0x279   : > { %v2002_v9 = vmax.f32 %v1876_v5, 0.0 }
 0x27a   : > { %v2066_v10 = vmax.f32 %v1940_v7, 0.0  ;;  %v1402_v11 = vpop.f32.mrb[112].mxu0  ;;  %v1658_v12 = vpop.f32.mrb[112].mxu1 }
 0x27b   : > { %v3371_v13 = vpack.c.bf16 %v2002_v9, %v2001_v8  ;;  %v1744_v15 = vmul.f32 %v4738_v25, %v1402_v11  ;;  %v1404_v16 = vpop.f32.mrb[113].mxu0  ;;  %v1808_v17 = vmul.f32 %v4738_v25, %v1658_v12  ;;  %v1660_v18 = vpop.f32.mrb[113].mxu1 }
 0x27c   : > { %v3531_v14 = vpack.c.bf16 %v2066_v10, %v2065_v6  ;;  %v1405_v19 = vpop.f32.mrb[114].mxu0  ;;  %v1661_v20 = vpop.f32.mrb[114].mxu1 }
 0x27d   : > { %3575 = vst [vmem:[%s4540_s23 + $0xd8] sm:$0xff] %v3371_v13   ;;  %v1877_v21 = vadd.f32 %v4744_v1, %v1744_v15  ;;  %v1745_v22 = vmul.f32 %v4738_v25, %v1405_v19  ;;  %v1407_v23 = vpop.f32.mrb[115].mxu0  ;;  %v1941_v24 = vadd.f32 %v4744_v1, %v1808_v17  ;;  %v1809_v26 = vmul.f32 %v4738_v25, %v1661_v20  ;;  %v1663_v63 = vpop.f32.mrb[115].mxu1 }
 0x27e   : > { %3607 = vst [vmem:[%s4540_s23 + $0x1d8] sm:$0xff] %v3531_v14  }
 0x27f   : > { %v1878_v27 = vadd.f32 %v4744_v1, %v1745_v22  ;;  %v2067_v28 = vmax.f32 %v1941_v24, 0.0  ;;  %v1942_v29 = vadd.f32 %v4744_v1, %v1809_v26  ;;  %v2003_v30 = vmax.f32 %v1877_v21, 0.0 }
 0x281   : > { %v2004_v31 = vmax.f32 %v1878_v27, 0.0  ;;  %v2068_v32 = vmax.f32 %v1942_v29, 0.0 }
 0x282   : > { %v1410_v33 = vpop.f32.mrb[116].mxu0  ;;  %v1666_v34 = vpop.f32.mrb[116].mxu1 }
 0x283   : > { %v3376_v35 = vpack.c.bf16 %v2004_v31, %v2003_v30  ;;  %v3536_v36 = vpack.c.bf16 %v2068_v32, %v2067_v28  ;;  %v1746_v37 = vmul.f32 %v4738_v25, %v1410_v33  ;;  %v1412_v38 = vpop.f32.mrb[117].mxu0  ;;  %v1810_v39 = vmul.f32 %v4738_v25, %v1666_v34  ;;  %v1668_v40 = vpop.f32.mrb[117].mxu1 }
 0x284   : > { %v1413_v41 = vpop.f32.mrb[118].mxu0  ;;  %v1669_v42 = vpop.f32.mrb[118].mxu1 }
 0x285   : > { %3576 = vst [vmem:[%s4540_s23 + $0xe0] sm:$0xff] %v3376_v35   ;;  %3608 = vst [vmem:[%s4540_s23 + $0x1e0] sm:$0xff] %v3536_v36   ;;  %v1879_v43 = vadd.f32 %v4744_v1, %v1746_v37  ;;  %v1747_v44 = vmul.f32 %v4738_v25, %v1413_v41  ;;  %v1415_v45 = vpop.f32.mrb[119].mxu0  ;;  %v1943_v46 = vadd.f32 %v4744_v1, %v1810_v39  ;;  %v1671_v48 = vpop.f32.mrb[119].mxu1 }
 0x286   : > { %v1811_v47 = vmul.f32 %v4738_v25, %v1669_v42 }
 0x287   : > { %v1880_v49 = vadd.f32 %v4744_v1, %v1747_v44  ;;  %v2069_v50 = vmax.f32 %v1943_v46, 0.0  ;;  %v2005_v52 = vmax.f32 %v1879_v43, 0.0 }
 0x288   : > { %v1944_v51 = vadd.f32 %v4744_v1, %v1811_v47 }
 0x289   : > { %v2006_v53 = vmax.f32 %v1880_v49, 0.0 }
 0x28a   : > { %v2070_v54 = vmax.f32 %v1944_v51, 0.0  ;;  %v1418_v55 = vpop.f32.mrb[120].mxu0  ;;  %v1674_v56 = vpop.f32.mrb[120].mxu1 }
 0x28b   : > { %v3381_v57 = vpack.c.bf16 %v2006_v53, %v2005_v52  ;;  %v1748_v59 = vmul.f32 %v4738_v25, %v1418_v55  ;;  %v1420_v60 = vpop.f32.mrb[121].mxu0  ;;  %v1812_v61 = vmul.f32 %v4738_v25, %v1674_v56  ;;  %v1676_v62 = vpop.f32.mrb[121].mxu1 }
 0x28c   : > { %v3541_v58 = vpack.c.bf16 %v2070_v54, %v2069_v50  ;;  %v1421_v0 = vpop.f32.mrb[122].mxu0  ;;  %v1677_v2 = vpop.f32.mrb[122].mxu1 }
 0x28d   : > { %3577 = vst [vmem:[%s4540_s23 + $0xe8] sm:$0xff] %v3381_v57   ;;  %v1881_v3 = vadd.f32 %v4744_v1, %v1748_v59  ;;  %v1749_v4 = vmul.f32 %v4738_v25, %v1421_v0  ;;  %v1423_v5 = vpop.f32.mrb[123].mxu0  ;;  %v1945_v6 = vadd.f32 %v4744_v1, %v1812_v61  ;;  %v1813_v7 = vmul.f32 %v4738_v25, %v1677_v2  ;;  %v1679_v8 = vpop.f32.mrb[123].mxu1 }
 0x28e   : > { %3609 = vst [vmem:[%s4540_s23 + $0x1e8] sm:$0xff] %v3541_v58  }
 0x28f   : > { %v1882_v9 = vadd.f32 %v4744_v1, %v1749_v4  ;;  %v2071_v10 = vmax.f32 %v1945_v6, 0.0  ;;  %v1946_v11 = vadd.f32 %v4744_v1, %v1813_v7  ;;  %v2007_v12 = vmax.f32 %v1881_v3, 0.0 }
 0x291   : > { %v2008_v13 = vmax.f32 %v1882_v9, 0.0  ;;  %v2072_v14 = vmax.f32 %v1946_v11, 0.0 }
 0x292   : > { %v1426_v15 = vpop.f32.mrb[124].mxu0 }
 0x293   : > { %v3386_v16 = vpack.c.bf16 %v2008_v13, %v2007_v12  ;;  %v3546_v17 = vpack.c.bf16 %v2072_v14, %v2071_v10  ;;  %v1750_v18 = vmul.f32 %v4738_v25, %v1426_v15  ;;  %v1428_v19 = vpop.f32.mrb[125].mxu0 }
 0x294   : > { %v1429_v20 = vpop.f32.mrb[126].mxu0 }
 0x295   : > { %3578 = vst [vmem:[%s4540_s23 + $0xf0] sm:$0xff] %v3386_v16   ;;  %3610 = vst [vmem:[%s4540_s23 + $0x1f0] sm:$0xff] %v3546_v17   ;;  %v1883_v21 = vadd.f32 %v4744_v1, %v1750_v18  ;;  %v1751_v22 = vmul.f32 %v4738_v25, %v1429_v20  ;;  %v1431_v23 = vpop.f32.mrb[127].mxu0 }
 0x297   : > { %v1884_v24 = vadd.f32 %v4744_v1, %v1751_v22  ;;  %v2009_v26 = vmax.f32 %v1883_v21, 0.0 }
 0x299   : > { %v2010_v63 = vmax.f32 %v1884_v24, 0.0 }
 0x29b   : > { %v3391_v27 = vpack.c.bf16 %v2010_v63, %v2009_v26 }
 0x29d   : > { %3579 = vst [vmem:[%s4540_s23 + $0xf8] sm:$0xff] %v3391_v27  }
 0x29e   : > { %4064 = shalt.err (!%p4061_p4)
}
 0x29f   : > { %s4065_s6 = scalar_lea.hbm %s4863_s20, 8064  ;;  %s4069_s25 = scalar_lea.hbm %s4913_s4, 201600 }
 0x2a0   : > { %p4066_p9 = scmp.ne.s32.totalorder %s4863_s20, %s4065_s6  ;;  %p4070_p8 = scmp.lt.u32.totalorder %s4863_s20, %s4913_s4 }
 0x2a1   : > { %p4071_p12 = scmp.lt.u32.totalorder %s4069_s25, %s4065_s6  ;;  %p4073_p0 = scmp.lt.u32.totalorder %s4065_s6, %s4863_s20 }
 0x2a2   : > { %p4067_p13 = pnand %p4066_p9, %p4309_p5 }
 0x2a3   : > { %p4072_p6 = por %p4071_p12, %p4070_p8 }
 0x2a4   : > { %p4068_p10 = pneg %p4067_p13 }
 0x2a5   : > { %p4074_p3 = por %p4073_p0, %p4072_p6 }
 0x2a7   : > { %p4075_p7 = pnand %p4074_p3, %p4068_p10 }
 0x2a9   : > { %4078 = shalt.err (!%p4075_p7)
}
 0x2aa   : > { %s4137_s23 = smov 64   ;;  %s4138_s29 = smov 4  }
 0x2ab   : > { %3660 = dma.vmem_to_hbm [thread:$0]  (%p4309_p5), %s4865_s5, 8064, %s4863_s20, %s2704_s14, %s4137_s23, %s4137_s23, %s4138_s29  }
 0x2ac PF: > { %p3687_p11 = scmp.ge.s32.totalorder %s4125_s18, 2  ;;  %s2732_s7 = sand.u32 1, %s4113_s15  }
 0x2ad   : > { %p4931_p2 = scmp.ne.s32.totalorder %s4918_s22, 0  ;;  %s2733_s8 = scalar_lea.sflag [#allocation4], %s2732_s7 }
 0x2af   : > { %p3677_p1 = pnand %p3687_p11, %p4931_p2 }
 0x2b1   : > { %4108 = dma.done.wait (!%p3677_p1), %s2733_s8, 8064  }
 0x2b2   : > { %4110 = vsyncadd (!%p3677_p1), %s2733_s8, 4294959232  ;;  %p19_p4 = scmp.ge.s32.totalorder %s4295_s10, 27   ;;  %s4932_s15 = smov %s4117_s16 }
 0x2b3   : > { %s4933_s16 = smov %s4121_s17  ;;  %s4934_s17 = smov %s4305_s12 }
 0x2b4   : > { %s4935_s18 = smov %s4295_s10  ;;  %21 = sbr.rel (!%p19_p4) target bundleno = 7 (0x7), region = 93 }
 0x2bb   :  { %2738 = vsyncpa [#allocation3], 1 }
 0x2bc   :  { %2740 = vsyncpa [#allocation3 + $0x1], 1 }
 0x2bd   :  { %2741 = vsyncpa [#allocation6], 1 }
 0x2be   :  { %2742 = vsyncpa [#allocation9], 1 }
 0x2bf   :  { %2743 = vsyncpa [#allocation4], 1 }
 0x2c0   :  { %2745 = vsyncpa [#allocation4 + $0x1], 1 }

</bundles_post_ra>
